<compile_context>
chip_gen: v5e
topology: v5e:2x2
jax: 0.10.0
libtpu: 0.0.40
codegen_flags: <defaults>
</compile_context>

<pallas_src>
import functools

import jax
import jax.numpy as jnp
from jax.experimental import pallas as pl
from jax.experimental.pallas import tpu as pltpu

EPS = 1e-5
LANE = 128                 # feature-dim padding granularity
MAX_ROW_TILE = 512         # node-row tile (512 rows ~ 85% of HBM roofline)
RESIDENT_MAX_NODES = 4096  # keep Z fully VMEM-resident below this padded node count


# ----------------------------------------------------------------------------- helpers
def _round_up(v, m):
    return (v + m - 1) // m * m


def _choose_row_tile(n):
    return max(LANE, min(MAX_ROW_TILE, _round_up(n, LANE)))


@functools.lru_cache(maxsize=1)
def _vmem_limit_bytes():
    # per-generation scoped-VMEM budget: ~48 MiB on v7x (64 MiB physical),
    # up to ~96 MiB on v5e / v6e (128 MiB physical). Falls back safely off-TPU.
    try:
        cap = int(pltpu.get_tpu_info().vmem_capacity_bytes)
        return int(min(cap * 3 // 4, 100 * 1024 * 1024))
    except Exception:
        return 48 * 1024 * 1024


def _compiler_params(dim_sem):
    return pltpu.CompilerParams(dimension_semantics=dim_sem,
                                vmem_limit_bytes=_vmem_limit_bytes())


def _pad2(a, rows, cols, value=0.0):
    return jnp.pad(a, ((0, rows - a.shape[0]), (0, cols - a.shape[1])),
                   constant_values=value)


def _pad_gamma_beta(gamma, beta, f_pad):
    g = jnp.pad(gamma.reshape(-1).astype(jnp.float32), (0, f_pad - gamma.shape[-1]))
    b = jnp.pad(beta.reshape(-1).astype(jnp.float32), (0, f_pad - beta.shape[-1]))
    return g, b  # gamma padded with 0 -> padded feature columns stay exactly 0


def build_gcn_adjacency(edge_index, num_nodes, num_nodes_padded=None, dtype=jnp.float32):
    """Dense D^{-1/2}(A+I)D^{-1/2} matching PyG GCNConv's gcn_norm (plain-JAX glue).

    Built directly at the padded shape and cast in one fused pass. Duplicate
    (non-self) edges accumulate; explicit self-loops collapse to a single weight-1
    self-loop per node. Padded rows/cols are exactly zero.
    """
    n_pad = num_nodes if num_nodes_padded is None else num_nodes_padded
    src, dst = edge_index[0], edge_index[1]
    w = jnp.where(src != dst, 1.0, 0.0).astype(jnp.float32)
    adj = jnp.zeros((n_pad, n_pad), jnp.float32).at[dst, src].add(w)
    idx = jnp.arange(n_pad)
    adj = adj.at[idx, idx].add((idx < num_nodes).astype(jnp.float32))
    deg = jnp.sum(adj, axis=1)
    d_inv_sqrt = jnp.where(deg > 0.0, jax.lax.rsqrt(jnp.maximum(deg, 1e-12)), 0.0)
    return (d_inv_sqrt[:, None] * adj * d_inv_sqrt[None, :]).astype(dtype)


# ----------------------------------------------------------------------------- kernels
def _colstats_kernel(x_ref, sum_ref, sumsq_ref):
    """Column sum / sum-of-squares, reduced over node-row tiles (used for x only)."""
    @pl.when(pl.program_id(0) == 0)
    def _():
        sum_ref[...] = jnp.zeros_like(sum_ref)
        sumsq_ref[...] = jnp.zeros_like(sumsq_ref)

    x = x_ref[...].astype(jnp.float32)
    sum_ref[...] += jnp.sum(x, axis=0, keepdims=True)
    sumsq_ref[...] += jnp.sum(x * x, axis=0, keepdims=True)


def _bn_linear_body(x_ref, ss_ref, w_ref):
    """Folded BN (per-feature scale/shift) then X @ W (bf16 MXU, f32 accumulation)."""
    xn = x_ref[...].astype(jnp.float32) * ss_ref[0:1, :] + ss_ref[1:2, :]
    z = jnp.dot(xn.astype(jnp.bfloat16), w_ref[...],
                preferred_element_type=jnp.float32)
    return xn, z


def _bn_linear_keep_kernel(x_ref, ss_ref, w_ref, xn_ref, z_ref):
    xn, z = _bn_linear_body(x_ref, ss_ref, w_ref)
    xn_ref[...] = xn.astype(xn_ref.dtype)   # normalized input kept (bf16) for residual
    z_ref[...] = z.astype(z_ref.dtype)


def _bn_linear_kernel(x_ref, ss_ref, w_ref, z_ref):
    _, z = _bn_linear_body(x_ref, ss_ref, w_ref)
    z_ref[...] = z.astype(z_ref.dtype)


def _relu_mask_stats(acc, b_ref, rows, n_true, h_ref, stats_ref):
    """Epilogue shared by both aggregation kernels: bias+relu, zero padded rows,
    store bf16 h and the per-row-tile (sum, sumsq) column-stat partials."""
    h = jnp.maximum(acc + b_ref[...], 0.0)
    h = jnp.where(rows < n_true, h, 0.0)
    h_ref[...] = h.astype(h_ref.dtype)
    s = jnp.sum(h, axis=0, keepdims=True)
    q = jnp.sum(h * h, axis=0, keepdims=True)
    stats_ref[...] = jnp.concatenate([s, q], axis=0)[None]


def _agg_relu_resident_kernel(n_ref, a_ref, z_ref, b_ref, h_ref, stats_ref, *, tm):
    """H[i_tile] = relu(A[i_tile, :] @ Z + b) with Z fully VMEM-resident."""
    i = pl.program_id(0)
    acc = jnp.dot(a_ref[...], z_ref[...], preferred_element_type=jnp.float32)
    rows = i * tm + jax.lax.broadcasted_iota(jnp.int32, acc.shape, 0)
    _relu_mask_stats(acc, b_ref, rows, n_ref[0], h_ref, stats_ref)


def _agg_relu_tiled_kernel(n_ref, a_ref, z_ref, b_ref, h_ref, stats_ref, acc_ref, *, tm):
    """H[i_tile] = relu(sum_k A[i_tile,k_tile] @ Z[k_tile] + b) for large graphs."""
    # program_id values are hoisted here: calling pl.program_id inside a pl.when
    # body puts it in a cond-branch jaxpr that cannot be lowered.
    i = pl.program_id(0)
    k = pl.program_id(1)
    rows = i * tm + jax.lax.broadcasted_iota(jnp.int32, acc_ref.shape, 0)
    n_true = n_ref[0]

    @pl.when(k == 0)
    def _():
        acc_ref[...] = jnp.zeros_like(acc_ref)

    acc_ref[...] += jnp.dot(a_ref[...], z_ref[...],
                            preferred_element_type=jnp.float32)

    @pl.when(k == pl.num_programs(1) - 1)
    def _():
        _relu_mask_stats(acc_ref[...], b_ref, rows, n_true, h_ref, stats_ref)


def _bn_residual_kernel(xn_ref, h_ref, ss_ref, out_ref):
    xn = xn_ref[...].astype(jnp.float32)
    h = h_ref[...].astype(jnp.float32)
    out_ref[...] = xn + h * ss_ref[0:1, :] + ss_ref[1:2, :]


# ----------------------------------------------------------------------------- wrappers
def _column_stats(x, row_tile):
    n_pad, f_pad = x.shape
    grid = (n_pad // row_tile,)
    return pl.pallas_call(
        _colstats_kernel,
        out_shape=(jax.ShapeDtypeStruct((1, f_pad), jnp.float32),
                   jax.ShapeDtypeStruct((1, f_pad), jnp.float32)),
        grid_spec=pltpu.PrefetchScalarGridSpec(
            num_scalar_prefetch=0, grid=grid,
            in_specs=[pl.BlockSpec((row_tile, f_pad), lambda k: (k, 0))],
            out_specs=(pl.BlockSpec((1, f_pad), lambda k: (0, 0)),
                       pl.BlockSpec((1, f_pad), lambda k: (0, 0)))),
        compiler_params=_compiler_params(("arbitrary",)),
    )(x)


def _bn_linear(x, ss, w, keep_norm, row_tile):
    n_pad, f_in = x.shape
    f_out = w.shape[1]
    grid = (n_pad // row_tile,)
    in_specs = [pl.BlockSpec((row_tile, f_in), lambda i: (i, 0)),
                pl.BlockSpec((2, f_in), lambda i: (0, 0)),
                pl.BlockSpec((f_in, f_out), lambda i: (0, 0))]
    z_spec = pl.BlockSpec((row_tile, f_out), lambda i: (i, 0))
    z_shape = jax.ShapeDtypeStruct((n_pad, f_out), jnp.bfloat16)
    if keep_norm:
        kernel = _bn_linear_keep_kernel
        out_shape = (jax.ShapeDtypeStruct((n_pad, f_in), jnp.bfloat16), z_shape)
        out_specs = (pl.BlockSpec((row_tile, f_in), lambda i: (i, 0)), z_spec)
    else:
        kernel = _bn_linear_kernel
        out_shape = z_shape
        out_specs = z_spec
    return pl.pallas_call(
        kernel, out_shape=out_shape,
        grid_spec=pltpu.PrefetchScalarGridSpec(
            num_scalar_prefetch=0, grid=grid,
            in_specs=in_specs, out_specs=out_specs),
        compiler_params=_compiler_params(("parallel",)),
    )(x, ss, w)


def _agg_relu(a, z, bias, n_arr, row_tile, *, force_tiled=False):
    n_pad = a.shape[0]
    f_out = z.shape[1]
    ni = n_pad // row_tile
    resident = (not force_tiled) and (n_pad <= RESIDENT_MAX_NODES)

    out_shape = (jax.ShapeDtypeStruct((n_pad, f_out), jnp.bfloat16),   # h (bf16)
                 jax.ShapeDtypeStruct((ni, 2, f_out), jnp.float32))    # fused col-stats
    n_spec = pl.BlockSpec(memory_space=pltpu.SMEM)                     # n_true scalar

    if resident:
        kernel = functools.partial(_agg_relu_resident_kernel, tm=row_tile)
        grid = (ni,)
        in_specs = [n_spec,
                    pl.BlockSpec((row_tile, n_pad), lambda i: (i, 0)),
                    pl.BlockSpec((n_pad, f_out), lambda i: (0, 0)),    # resident Z
                    pl.BlockSpec((1, f_out), lambda i: (0, 0))]
        out_specs = (pl.BlockSpec((row_tile, f_out), lambda i: (i, 0)),
                     pl.BlockSpec((1, 2, f_out), lambda i: (i, 0, 0)))
        scratch = []
        dim_sem = ("parallel",)
    else:
        kernel = functools.partial(_agg_relu_tiled_kernel, tm=row_tile)
        nk = n_pad // row_tile
        grid = (ni, nk)
        in_specs = [n_spec,
                    pl.BlockSpec((row_tile, row_tile), lambda i, k: (i, k)),
                    pl.BlockSpec((row_tile, f_out), lambda i, k: (k, 0)),
                    pl.BlockSpec((1, f_out), lambda i, k: (0, 0))]
        out_specs = (pl.BlockSpec((row_tile, f_out), lambda i, k: (i, 0)),
                     pl.BlockSpec((1, 2, f_out), lambda i, k: (i, 0, 0)))
        scratch = [pltpu.VMEM((row_tile, f_out), jnp.float32)]
        dim_sem = ("parallel", "arbitrary")

    return pl.pallas_call(
        kernel, out_shape=out_shape,
        grid_spec=pltpu.PrefetchScalarGridSpec(
            num_scalar_prefetch=0, grid=grid,
            in_specs=in_specs, out_specs=out_specs, scratch_shapes=scratch),
        compiler_params=_compiler_params(dim_sem),
    )(n_arr, a, z, bias)


def _bn_residual(xn, h, ss, row_tile):
    n_pad, f = xn.shape
    grid = (n_pad // row_tile,)
    return pl.pallas_call(
        _bn_residual_kernel,
        out_shape=jax.ShapeDtypeStruct((n_pad, f), jnp.float32),
        grid_spec=pltpu.PrefetchScalarGridSpec(
            num_scalar_prefetch=0, grid=grid,
            in_specs=[pl.BlockSpec((row_tile, f), lambda i: (i, 0)),
                      pl.BlockSpec((row_tile, f), lambda i: (i, 0)),
                      pl.BlockSpec((2, f), lambda i: (0, 0))],
            out_specs=pl.BlockSpec((row_tile, f), lambda i: (i, 0))),
        compiler_params=_compiler_params(("parallel",)),
    )(xn, h, ss)


def _scale_shift(col_sum, col_sumsq, n_true, gamma, beta):
    # biased batch statistics over the true node count (padded rows contribute 0).
    mean = col_sum.reshape(-1) / n_true
    var = jnp.maximum(col_sumsq.reshape(-1) / n_true - mean * mean, 0.0)
    scale = gamma * jax.lax.rsqrt(var + EPS)
    shift = beta - mean * scale
    return jnp.stack([scale, shift], axis=0)     # packed [2, F] f32


# ----------------------------------------------------------------------------- forward
def graphnet_feature(x, edge_index, params, *, row_tile=None, force_tiled=False):
    n, c_in = x.shape
    hidden = params["w1"].shape[1]
    assert params["w2"].shape == (hidden, hidden)
    assert hidden == c_in, "residual x_norm + h requires hidden_size == c_in"

    tm = row_tile if row_tile is not None else _choose_row_tile(n)
    n_pad = _round_up(n, tm)
    c_pad = _round_up(c_in, LANE)
    h_pad = _round_up(hidden, LANE)

    # TODO(synk): for large sparse graphs, replace the dense A_hat by a CSR neighbour
    # table streamed via PrefetchScalarGridSpec / manual DMA gather (O(E) traffic).
    a_p = build_gcn_adjacency(edge_index, n, n_pad, dtype=jnp.bfloat16)

    x_p = _pad2(x.astype(jnp.float32), n_pad, c_pad)
    w1_p = _pad2(params["w1"].astype(jnp.float32), c_pad, h_pad).astype(jnp.bfloat16)
    w2_p = _pad2(params["w2"].astype(jnp.float32), h_pad, h_pad).astype(jnp.bfloat16)
    b1_p = _pad2(params["b1"].reshape(1, -1).astype(jnp.float32), 1, h_pad)
    b2_p = _pad2(params["b2"].reshape(1, -1).astype(jnp.float32), 1, h_pad)

    g0, be0 = _pad_gamma_beta(params["g0"], params["be0"], c_pad)
    g1, be1 = _pad_gamma_beta(params["g1"], params["be1"], h_pad)
    g2, be2 = _pad_gamma_beta(params["g2"], params["be2"], h_pad)

    n_arr = jnp.full((1,), n, jnp.int32)

    # stage 0: BN0 stats -> folded BN0 + X@W1 -> A@Z1 + b1 + relu (fused col-stats)
    s0, q0 = _column_stats(x_p, tm)
    ss0 = _scale_shift(s0, q0, n, g0, be0)
    xn, z1 = _bn_linear(x_p, ss0, w1_p, keep_norm=True, row_tile=tm)
    h1, st1 = _agg_relu(a_p, z1, b1_p, n_arr, tm, force_tiled=force_tiled)

    # stage 1: BN1 folded into GCN2 transform -> A@Z2 + b2 + relu (fused col-stats)
    t1 = jnp.sum(st1, axis=0)
    ss1 = _scale_shift(t1[0], t1[1], n, g1, be1)
    z2 = _bn_linear(h1, ss1, w2_p, keep_norm=False, row_tile=tm)
    h2, st2 = _agg_relu(a_p, z2, b2_p, n_arr, tm, force_tiled=force_tiled)

    # stage 2: BN2 folded into the residual add
    t2 = jnp.sum(st2, axis=0)
    ss2 = _scale_shift(t2[0], t2[1], n, g2, be2)
    out = _bn_residual(xn, h2, ss2, tm)
    return out[:n, :c_in]


# ----------------------------------------------------------------------------- reference
def graphnet_reference(x, edge_index, params):
    """Pure-JAX f32 reference of the module forward (same adjacency semantics)."""
    a_hat = build_gcn_adjacency(edge_index, x.shape[0])

    def bn(v, g, b):
        mean = jnp.mean(v, axis=0, keepdims=True)
        var = jnp.mean((v - mean) ** 2, axis=0, keepdims=True)
        return (v - mean) * jax.lax.rsqrt(var + EPS) * g + b

    xn = bn(x, params["g0"], params["be0"])
    h = a_hat @ (xn @ params["w1"]) + params["b1"]
    h = bn(jnp.maximum(h, 0.0), params["g1"], params["be1"])
    h = a_hat @ (h @ params["w2"]) + params["b2"]
    h = bn(jnp.maximum(h, 0.0), params["g2"], params["be2"])
    return xn + h


def init_params(key, c_in, hidden):
    k1, k2, k3, k4, k5, k6, k7, k8 = jax.random.split(key, 8)
    w1 = jax.random.normal(k1, (c_in, hidden), jnp.float32) * (1.0 / jnp.sqrt(c_in))
    w2 = jax.random.normal(k2, (hidden, hidden), jnp.float32) * (1.0 / jnp.sqrt(hidden))
    b1 = 0.1 * jax.random.normal(k3, (hidden,), jnp.float32)
    b2 = 0.1 * jax.random.normal(k4, (hidden,), jnp.float32)
    g0 = 1.0 + 0.1 * jax.random.normal(k5, (c_in,), jnp.float32)
    g1 = 1.0 + 0.1 * jax.random.normal(k6, (hidden,), jnp.float32)
    g2 = 1.0 + 0.1 * jax.random.normal(k7, (hidden,), jnp.float32)
    be0 = 0.1 * jax.random.normal(k8, (c_in,), jnp.float32)
    be1 = jnp.zeros((hidden,), jnp.float32)
    be2 = jnp.zeros((hidden,), jnp.float32)
    return dict(w1=w1, b1=b1, w2=w2, b2=b2,
                g0=g0, be0=be0, g1=g1, be1=be1, g2=g2, be2=be2)


if __name__ == "__main__":
    base_key = jax.random.PRNGKey(0)

    def run_case(case_idx, n, c, e, **kwargs):
        key = jax.random.fold_in(base_key, case_idx)
        kx, ke, kp = jax.random.split(key, 3)
        x = jax.random.normal(kx, (n, c), jnp.float32)
        edge_index = jax.random.randint(ke, (2, e), 0, n, dtype=jnp.int32)
        params = init_params(kp, c, c)           # residual needs hidden == c_in
        fwd = jax.jit(functools.partial(graphnet_feature, **kwargs))
        out = fwd(x, edge_index, params)
        jax.block_until_ready(out)
        assert out.shape == (n, c)
        ref = graphnet_reference(x, edge_index, params)
        err = float(jnp.max(jnp.abs(out - ref)))
        assert err < 0.2, f"case {case_idx}: max abs error vs f32 reference: {err}"

    # small graph: resident-Z aggregation path
    run_case(0, n=16, c=32, e=40)
    # larger graph, forced k-tiled accumulate path (multi-tile grid coverage)
    run_case(1, n=300, c=64, e=900, row_tile=128, force_tiled=True)

    print("KERNEL_OK")
</pallas_src>

<mosaic_0001>
module attributes {stable_mosaic.version = 11 : i64} {
  func.func @_colstats_kernel(%arg0: i32, %arg1: memref<128x128xf32, #tpu.memory_space<vmem>>, %arg2: memref<1x128xf32, #tpu.memory_space<vmem>>, %arg3: memref<1x128xf32, #tpu.memory_space<vmem>>) attributes {dimension_semantics = [#tpu.dimension_semantics<arbitrary>], iteration_bounds = array<i64: 1>, scalar_prefetch = 0 : i64, scratch_operands = 0 : i64, tpu.core_type = #tpu.core_type<tc>, window_params = [{transform_indices = @transform_0, window_bounds = array<i64: 128, 128>}, {pipeline_mode = #tpu.pipeline_mode<synchronous>, transform_indices = @transform_1, window_bounds = array<i64: 1, 128>}, {pipeline_mode = #tpu.pipeline_mode<synchronous>, transform_indices = @transform_2, window_bounds = array<i64: 1, 128>}]} {
    %c0_i32 = arith.constant 0 : i32
    %0 = arith.cmpi eq, %arg0, %c0_i32 : i32
    %1 = arith.extui %0 : i1 to i32
    %c0_i32_0 = arith.constant 0 : i32
    %2 = arith.cmpi ne, %1, %c0_i32_0 : i32
    scf.if %2 {
      %cst_11 = arith.constant 0.000000e+00 : f32
      %15 = vector.broadcast %cst_11 : f32 to vector<1x128xf32>
      %c0_12 = arith.constant 0 : index
      %c0_13 = arith.constant 0 : index
      %16 = vector.load %arg2[%c0_12, %c0_13] : memref<1x128xf32, #tpu.memory_space<vmem>>, vector<1x128xf32>
      tpu.vector_store %arg2[%c0_12, %c0_13], %15 {strides = array<i32>} : memref<1x128xf32, #tpu.memory_space<vmem>>, vector<1x128xf32>,
      %cst_14 = arith.constant 0.000000e+00 : f32
      %17 = vector.broadcast %cst_14 : f32 to vector<1x128xf32>
      %c0_15 = arith.constant 0 : index
      %c0_16 = arith.constant 0 : index
      %18 = vector.load %arg3[%c0_15, %c0_16] : memref<1x128xf32, #tpu.memory_space<vmem>>, vector<1x128xf32>
      tpu.vector_store %arg3[%c0_15, %c0_16], %17 {strides = array<i32>} : memref<1x128xf32, #tpu.memory_space<vmem>>, vector<1x128xf32>,
    } else {
    }
    %c0 = arith.constant 0 : index
    %c0_1 = arith.constant 0 : index
    %3 = vector.load %arg1[%c0, %c0_1] : memref<128x128xf32, #tpu.memory_space<vmem>>, vector<128x128xf32>
    %c0_2 = arith.constant 0 : index
    %c0_3 = arith.constant 0 : index
    %4 = vector.load %arg2[%c0_2, %c0_3] : memref<1x128xf32, #tpu.memory_space<vmem>>, vector<1x128xf32>
    %cst = arith.constant dense<0.000000e+00> : vector<128xf32>
    %5 = vector.multi_reduction <add>, %3, %cst [0] : vector<128x128xf32> to vector<128xf32>
    %6 = vector.shape_cast %5 : vector<128xf32> to vector<1x128xf32>
    %7 = arith.addf %4, %6 : vector<1x128xf32>
    %c0_4 = arith.constant 0 : index
    %c0_5 = arith.constant 0 : index
    %8 = vector.load %arg2[%c0_4, %c0_5] : memref<1x128xf32, #tpu.memory_space<vmem>>, vector<1x128xf32>
    tpu.vector_store %arg2[%c0_4, %c0_5], %7 {strides = array<i32>} : memref<1x128xf32, #tpu.memory_space<vmem>>, vector<1x128xf32>,
    %c0_6 = arith.constant 0 : index
    %c0_7 = arith.constant 0 : index
    %9 = vector.load %arg3[%c0_6, %c0_7] : memref<1x128xf32, #tpu.memory_space<vmem>>, vector<1x128xf32>
    %10 = arith.mulf %3, %3 : vector<128x128xf32>
    %cst_8 = arith.constant dense<0.000000e+00> : vector<128xf32>
    %11 = vector.multi_reduction <add>, %10, %cst_8 [0] : vector<128x128xf32> to vector<128xf32>
    %12 = vector.shape_cast %11 : vector<128xf32> to vector<1x128xf32>
    %13 = arith.addf %9, %12 : vector<1x128xf32>
    %c0_9 = arith.constant 0 : index
    %c0_10 = arith.constant 0 : index
    %14 = vector.load %arg3[%c0_9, %c0_10] : memref<1x128xf32, #tpu.memory_space<vmem>>, vector<1x128xf32>
    tpu.vector_store %arg3[%c0_9, %c0_10], %13 {strides = array<i32>} : memref<1x128xf32, #tpu.memory_space<vmem>>, vector<1x128xf32>,
    return
  }
  func.func @transform_0(%arg0: i32) -> (i32, i32) {
    %c0_i32 = arith.constant 0 : i32
    %c0_i32_0 = arith.constant 0 : i32
    return %arg0, %c0_i32 : i32, i32
  }
  func.func @transform_1(%arg0: i32) -> (i32, i32) {
    %c0_i32 = arith.constant 0 : i32
    %c0_i32_0 = arith.constant 0 : i32
    %c0_i32_1 = arith.constant 0 : i32
    return %c0_i32, %c0_i32_0 : i32, i32
  }
  func.func @transform_2(%arg0: i32) -> (i32, i32) {
    %c0_i32 = arith.constant 0 : i32
    %c0_i32_0 = arith.constant 0 : i32
    %c0_i32_1 = arith.constant 0 : i32
    return %c0_i32, %c0_i32_0 : i32, i32
  }
}

module attributes {stable_mosaic.version = 11 : i64} {
  func.func @_bn_linear_keep_kernel(%arg0: i32, %arg1: memref<128x128xf32, #tpu.memory_space<vmem>>, %arg2: memref<2x128xf32, #tpu.memory_space<vmem>>, %arg3: memref<128x128xbf16, #tpu.memory_space<vmem>>, %arg4: memref<128x128xbf16, #tpu.memory_space<vmem>>, %arg5: memref<128x128xbf16, #tpu.memory_space<vmem>>) attributes {dimension_semantics = [#tpu.dimension_semantics<parallel>], iteration_bounds = array<i64: 1>, scalar_prefetch = 0 : i64, scratch_operands = 0 : i64, tpu.core_type = #tpu.core_type<tc>, window_params = [{transform_indices = @transform_0, window_bounds = array<i64: 128, 128>}, {pipeline_mode = #tpu.pipeline_mode<synchronous>, transform_indices = @transform_1, window_bounds = array<i64: 2, 128>}, {pipeline_mode = #tpu.pipeline_mode<synchronous>, transform_indices = @transform_2, window_bounds = array<i64: 128, 128>}, {transform_indices = @transform_3, window_bounds = array<i64: 128, 128>}, {transform_indices = @transform_4, window_bounds = array<i64: 128, 128>}]} {
    %c0 = arith.constant 0 : index
    %c0_0 = arith.constant 0 : index
    %0 = vector.load %arg1[%c0, %c0_0] : memref<128x128xf32, #tpu.memory_space<vmem>>, vector<128x128xf32>
    %c0_1 = arith.constant 0 : index
    %c0_2 = arith.constant 0 : index
    %1 = vector.load %arg2[%c0_1, %c0_2] : memref<2x128xf32, #tpu.memory_space<vmem>>, vector<1x128xf32>
    %2 = vector.broadcast %1 : vector<1x128xf32> to vector<128x128xf32>
    %3 = arith.mulf %0, %2 : vector<128x128xf32>
    %c1 = arith.constant 1 : index
    %c0_3 = arith.constant 0 : index
    %4 = vector.load %arg2[%c1, %c0_3] : memref<2x128xf32, #tpu.memory_space<vmem>>, vector<1x128xf32>
    %5 = vector.broadcast %4 : vector<1x128xf32> to vector<128x128xf32>
    %6 = arith.addf %3, %5 : vector<128x128xf32>
    %7 = arith.truncf %6 : vector<128x128xf32> to vector<128x128xbf16>
    %c0_4 = arith.constant 0 : index
    %c0_5 = arith.constant 0 : index
    %8 = vector.load %arg3[%c0_4, %c0_5] : memref<128x128xbf16, #tpu.memory_space<vmem>>, vector<128x128xbf16>
    %cst = arith.constant dense<0.000000e+00> : vector<128x128xf32>
    %9 = tpu.matmul %7, %8, %cst {dimension_numbers = #tpu.dot_dimension_numbers<[1], [0], [0], [1], [0, 0, 1, 1], [], []>} : vector<128x128xbf16>, vector<128x128xbf16>, vector<128x128xf32> -> vector<128x128xf32>
    %10 = arith.truncf %6 : vector<128x128xf32> to vector<128x128xbf16>
    %c0_6 = arith.constant 0 : index
    %c0_7 = arith.constant 0 : index
    %11 = vector.load %arg4[%c0_6, %c0_7] : memref<128x128xbf16, #tpu.memory_space<vmem>>, vector<128x128xbf16>
    tpu.vector_store %arg4[%c0_6, %c0_7], %10 {strides = array<i32>} : memref<128x128xbf16, #tpu.memory_space<vmem>>, vector<128x128xbf16>,
    %12 = arith.truncf %9 : vector<128x128xf32> to vector<128x128xbf16>
    %c0_8 = arith.constant 0 : index
    %c0_9 = arith.constant 0 : index
    %13 = vector.load %arg5[%c0_8, %c0_9] : memref<128x128xbf16, #tpu.memory_space<vmem>>, vector<128x128xbf16>
    tpu.vector_store %arg5[%c0_8, %c0_9], %12 {strides = array<i32>} : memref<128x128xbf16, #tpu.memory_space<vmem>>, vector<128x128xbf16>,
    return
  }
  func.func @transform_0(%arg0: i32) -> (i32, i32) {
    %c0_i32 = arith.constant 0 : i32
    %c0_i32_0 = arith.constant 0 : i32
    return %arg0, %c0_i32 : i32, i32
  }
  func.func @transform_1(%arg0: i32) -> (i32, i32) {
    %c0_i32 = arith.constant 0 : i32
    %c0_i32_0 = arith.constant 0 : i32
    %c0_i32_1 = arith.constant 0 : i32
    return %c0_i32, %c0_i32_0 : i32, i32
  }
  func.func @transform_2(%arg0: i32) -> (i32, i32) {
    %c0_i32 = arith.constant 0 : i32
    %c0_i32_0 = arith.constant 0 : i32
    %c0_i32_1 = arith.constant 0 : i32
    return %c0_i32, %c0_i32_0 : i32, i32
  }
  func.func @transform_3(%arg0: i32) -> (i32, i32) {
    %c0_i32 = arith.constant 0 : i32
    %c0_i32_0 = arith.constant 0 : i32
    return %arg0, %c0_i32 : i32, i32
  }
  func.func @transform_4(%arg0: i32) -> (i32, i32) {
    %c0_i32 = arith.constant 0 : i32
    %c0_i32_0 = arith.constant 0 : i32
    return %arg0, %c0_i32 : i32, i32
  }
}

module attributes {stable_mosaic.version = 11 : i64} {
  func.func @_agg_relu_resident_kernel(%arg0: i32, %arg1: memref<1xi32, #tpu.memory_space<smem>>, %arg2: memref<128x128xbf16, #tpu.memory_space<vmem>>, %arg3: memref<128x128xbf16, #tpu.memory_space<vmem>>, %arg4: memref<1x128xf32, #tpu.memory_space<vmem>>, %arg5: memref<128x128xbf16, #tpu.memory_space<vmem>>, %arg6: memref<1x2x128xf32, #tpu.memory_space<vmem>>) attributes {dimension_semantics = [#tpu.dimension_semantics<parallel>], iteration_bounds = array<i64: 1>, scalar_prefetch = 0 : i64, scratch_operands = 0 : i64, tpu.core_type = #tpu.core_type<tc>, window_params = [{transform_indices = @transform_0, window_bounds = array<i64: 1>}, {transform_indices = @transform_1, window_bounds = array<i64: 128, 128>}, {pipeline_mode = #tpu.pipeline_mode<synchronous>, transform_indices = @transform_2, window_bounds = array<i64: 128, 128>}, {pipeline_mode = #tpu.pipeline_mode<synchronous>, transform_indices = @transform_3, window_bounds = array<i64: 1, 128>}, {transform_indices = @transform_4, window_bounds = array<i64: 128, 128>}, {transform_indices = @transform_5, window_bounds = array<i64: 1, 2, 128>}]} {
    %c0 = arith.constant 0 : index
    %c0_0 = arith.constant 0 : index
    %0 = vector.load %arg2[%c0, %c0_0] : memref<128x128xbf16, #tpu.memory_space<vmem>>, vector<128x128xbf16>
    %c0_1 = arith.constant 0 : index
    %c0_2 = arith.constant 0 : index
    %1 = vector.load %arg3[%c0_1, %c0_2] : memref<128x128xbf16, #tpu.memory_space<vmem>>, vector<128x128xbf16>
    %cst = arith.constant dense<0.000000e+00> : vector<128x128xf32>
    %2 = tpu.matmul %0, %1, %cst {dimension_numbers = #tpu.dot_dimension_numbers<[1], [0], [0], [1], [0, 0, 1, 1], [], []>} : vector<128x128xbf16>, vector<128x128xbf16>, vector<128x128xf32> -> vector<128x128xf32>
    %c128_i32 = arith.constant 128 : i32
    %3 = arith.muli %arg0, %c128_i32 : i32
    %4 = tpu.iota {dimensions = array<i32: 0>} : vector<128x128xi32>
    %5 = vector.broadcast %3 : i32 to vector<128x128xi32>
    %6 = arith.addi %5, %4 : vector<128x128xi32>
    %c0_3 = arith.constant 0 : index
    %7 = memref.load %arg1[%c0_3] : memref<1xi32, #tpu.memory_space<smem>>
    %c0_4 = arith.constant 0 : index
    %c0_5 = arith.constant 0 : index
    %8 = vector.load %arg4[%c0_4, %c0_5] : memref<1x128xf32, #tpu.memory_space<vmem>>, vector<1x128xf32>
    %9 = vector.broadcast %8 : vector<1x128xf32> to vector<128x128xf32>
    %10 = arith.addf %2, %9 : vector<128x128xf32>
    %cst_6 = arith.constant 0.000000e+00 : f32
    %11 = vector.broadcast %cst_6 : f32 to vector<128x128xf32>
    %12 = arith.maximumf %10, %11 : vector<128x128xf32>
    %13 = vector.broadcast %7 : i32 to vector<128x128xi32>
    %14 = arith.cmpi slt, %6, %13 : vector<128x128xi32>
    %cst_7 = arith.constant 0.000000e+00 : f32
    %15 = vector.broadcast %cst_7 : f32 to vector<128x128xf32>
    %16 = arith.select %14, %12, %15 : vector<128x128xi1>, vector<128x128xf32>
    %17 = arith.truncf %16 : vector<128x128xf32> to vector<128x128xbf16>
    %c0_8 = arith.constant 0 : index
    %c0_9 = arith.constant 0 : index
    %18 = vector.load %arg5[%c0_8, %c0_9] : memref<128x128xbf16, #tpu.memory_space<vmem>>, vector<128x128xbf16>
    tpu.vector_store %arg5[%c0_8, %c0_9], %17 {strides = array<i32>} : memref<128x128xbf16, #tpu.memory_space<vmem>>, vector<128x128xbf16>,
    %cst_10 = arith.constant dense<0.000000e+00> : vector<128xf32>
    %19 = vector.multi_reduction <add>, %16, %cst_10 [0] : vector<128x128xf32> to vector<128xf32>
    %20 = vector.shape_cast %19 : vector<128xf32> to vector<1x128xf32>
    %21 = arith.mulf %16, %16 : vector<128x128xf32>
    %cst_11 = arith.constant dense<0.000000e+00> : vector<128xf32>
    %22 = vector.multi_reduction <add>, %21, %cst_11 [0] : vector<128x128xf32> to vector<128xf32>
    %23 = vector.shape_cast %22 : vector<128xf32> to vector<1x128xf32>
    %24 = tpu.concatenate %20, %23 in 0 : vector<1x128xf32>, vector<1x128xf32> -> vector<2x128xf32>
    %25 = vector.shape_cast %24 : vector<2x128xf32> to vector<1x2x128xf32>
    %c0_12 = arith.constant 0 : index
    %c0_13 = arith.constant 0 : index
    %c0_14 = arith.constant 0 : index
    %26 = vector.load %arg6[%c0_12, %c0_13, %c0_14] : memref<1x2x128xf32, #tpu.memory_space<vmem>>, vector<1x2x128xf32>
    tpu.vector_store %arg6[%c0_12, %c0_13, %c0_14], %25 {strides = array<i32>} : memref<1x2x128xf32, #tpu.memory_space<vmem>>, vector<1x2x128xf32>,
    return
  }
  func.func @transform_0(%arg0: i32) -> i32 {
    %c0_i32 = arith.constant 0 : i32
    %c0_i32_0 = arith.constant 0 : i32
    return %c0_i32 : i32
  }
  func.func @transform_1(%arg0: i32) -> (i32, i32) {
    %c0_i32 = arith.constant 0 : i32
    %c0_i32_0 = arith.constant 0 : i32
    return %arg0, %c0_i32 : i32, i32
  }
  func.func @transform_2(%arg0: i32) -> (i32, i32) {
    %c0_i32 = arith.constant 0 : i32
    %c0_i32_0 = arith.constant 0 : i32
    %c0_i32_1 = arith.constant 0 : i32
    return %c0_i32, %c0_i32_0 : i32, i32
  }
  func.func @transform_3(%arg0: i32) -> (i32, i32) {
    %c0_i32 = arith.constant 0 : i32
    %c0_i32_0 = arith.constant 0 : i32
    %c0_i32_1 = arith.constant 0 : i32
    return %c0_i32, %c0_i32_0 : i32, i32
  }
  func.func @transform_4(%arg0: i32) -> (i32, i32) {
    %c0_i32 = arith.constant 0 : i32
    %c0_i32_0 = arith.constant 0 : i32
    return %arg0, %c0_i32 : i32, i32
  }
  func.func @transform_5(%arg0: i32) -> (i32, i32, i32) {
    %c0_i32 = arith.constant 0 : i32
    %c0_i32_0 = arith.constant 0 : i32
    %c0_i32_1 = arith.constant 0 : i32
    return %arg0, %c0_i32, %c0_i32_0 : i32, i32, i32
  }
}

module attributes {stable_mosaic.version = 11 : i64} {
  func.func @_bn_linear_kernel(%arg0: i32, %arg1: memref<128x128xbf16, #tpu.memory_space<vmem>>, %arg2: memref<2x128xf32, #tpu.memory_space<vmem>>, %arg3: memref<128x128xbf16, #tpu.memory_space<vmem>>, %arg4: memref<128x128xbf16, #tpu.memory_space<vmem>>) attributes {dimension_semantics = [#tpu.dimension_semantics<parallel>], iteration_bounds = array<i64: 1>, scalar_prefetch = 0 : i64, scratch_operands = 0 : i64, tpu.core_type = #tpu.core_type<tc>, window_params = [{transform_indices = @transform_0, window_bounds = array<i64: 128, 128>}, {pipeline_mode = #tpu.pipeline_mode<synchronous>, transform_indices = @transform_1, window_bounds = array<i64: 2, 128>}, {pipeline_mode = #tpu.pipeline_mode<synchronous>, transform_indices = @transform_2, window_bounds = array<i64: 128, 128>}, {transform_indices = @transform_3, window_bounds = array<i64: 128, 128>}]} {
    %c0 = arith.constant 0 : index
    %c0_0 = arith.constant 0 : index
    %0 = vector.load %arg1[%c0, %c0_0] : memref<128x128xbf16, #tpu.memory_space<vmem>>, vector<128x128xbf16>
    %1 = arith.extf %0 : vector<128x128xbf16> to vector<128x128xf32>
    %c0_1 = arith.constant 0 : index
    %c0_2 = arith.constant 0 : index
    %2 = vector.load %arg2[%c0_1, %c0_2] : memref<2x128xf32, #tpu.memory_space<vmem>>, vector<1x128xf32>
    %3 = vector.broadcast %2 : vector<1x128xf32> to vector<128x128xf32>
    %4 = arith.mulf %1, %3 : vector<128x128xf32>
    %c1 = arith.constant 1 : index
    %c0_3 = arith.constant 0 : index
    %5 = vector.load %arg2[%c1, %c0_3] : memref<2x128xf32, #tpu.memory_space<vmem>>, vector<1x128xf32>
    %6 = vector.broadcast %5 : vector<1x128xf32> to vector<128x128xf32>
    %7 = arith.addf %4, %6 : vector<128x128xf32>
    %8 = arith.truncf %7 : vector<128x128xf32> to vector<128x128xbf16>
    %c0_4 = arith.constant 0 : index
    %c0_5 = arith.constant 0 : index
    %9 = vector.load %arg3[%c0_4, %c0_5] : memref<128x128xbf16, #tpu.memory_space<vmem>>, vector<128x128xbf16>
    %cst = arith.constant dense<0.000000e+00> : vector<128x128xf32>
    %10 = tpu.matmul %8, %9, %cst {dimension_numbers = #tpu.dot_dimension_numbers<[1], [0], [0], [1], [0, 0, 1, 1], [], []>} : vector<128x128xbf16>, vector<128x128xbf16>, vector<128x128xf32> -> vector<128x128xf32>
    %11 = arith.truncf %10 : vector<128x128xf32> to vector<128x128xbf16>
    %c0_6 = arith.constant 0 : index
    %c0_7 = arith.constant 0 : index
    %12 = vector.load %arg4[%c0_6, %c0_7] : memref<128x128xbf16, #tpu.memory_space<vmem>>, vector<128x128xbf16>
    tpu.vector_store %arg4[%c0_6, %c0_7], %11 {strides = array<i32>} : memref<128x128xbf16, #tpu.memory_space<vmem>>, vector<128x128xbf16>,
    return
  }
  func.func @transform_0(%arg0: i32) -> (i32, i32) {
    %c0_i32 = arith.constant 0 : i32
    %c0_i32_0 = arith.constant 0 : i32
    return %arg0, %c0_i32 : i32, i32
  }
  func.func @transform_1(%arg0: i32) -> (i32, i32) {
    %c0_i32 = arith.constant 0 : i32
    %c0_i32_0 = arith.constant 0 : i32
    %c0_i32_1 = arith.constant 0 : i32
    return %c0_i32, %c0_i32_0 : i32, i32
  }
  func.func @transform_2(%arg0: i32) -> (i32, i32) {
    %c0_i32 = arith.constant 0 : i32
    %c0_i32_0 = arith.constant 0 : i32
    %c0_i32_1 = arith.constant 0 : i32
    return %c0_i32, %c0_i32_0 : i32, i32
  }
  func.func @transform_3(%arg0: i32) -> (i32, i32) {
    %c0_i32 = arith.constant 0 : i32
    %c0_i32_0 = arith.constant 0 : i32
    return %arg0, %c0_i32 : i32, i32
  }
}

module attributes {stable_mosaic.version = 11 : i64} {
  func.func @_bn_residual_kernel(%arg0: i32, %arg1: memref<128x128xbf16, #tpu.memory_space<vmem>>, %arg2: memref<128x128xbf16, #tpu.memory_space<vmem>>, %arg3: memref<2x128xf32, #tpu.memory_space<vmem>>, %arg4: memref<128x128xf32, #tpu.memory_space<vmem>>) attributes {dimension_semantics = [#tpu.dimension_semantics<parallel>], iteration_bounds = array<i64: 1>, scalar_prefetch = 0 : i64, scratch_operands = 0 : i64, tpu.core_type = #tpu.core_type<tc>, window_params = [{transform_indices = @transform_0, window_bounds = array<i64: 128, 128>}, {transform_indices = @transform_1, window_bounds = array<i64: 128, 128>}, {pipeline_mode = #tpu.pipeline_mode<synchronous>, transform_indices = @transform_2, window_bounds = array<i64: 2, 128>}, {transform_indices = @transform_3, window_bounds = array<i64: 128, 128>}]} {
    %c0 = arith.constant 0 : index
    %c0_0 = arith.constant 0 : index
    %0 = vector.load %arg1[%c0, %c0_0] : memref<128x128xbf16, #tpu.memory_space<vmem>>, vector<128x128xbf16>
    %1 = arith.extf %0 : vector<128x128xbf16> to vector<128x128xf32>
    %c0_1 = arith.constant 0 : index
    %c0_2 = arith.constant 0 : index
    %2 = vector.load %arg2[%c0_1, %c0_2] : memref<128x128xbf16, #tpu.memory_space<vmem>>, vector<128x128xbf16>
    %3 = arith.extf %2 : vector<128x128xbf16> to vector<128x128xf32>
    %c0_3 = arith.constant 0 : index
    %c0_4 = arith.constant 0 : index
    %4 = vector.load %arg3[%c0_3, %c0_4] : memref<2x128xf32, #tpu.memory_space<vmem>>, vector<1x128xf32>
    %5 = vector.broadcast %4 : vector<1x128xf32> to vector<128x128xf32>
    %6 = arith.mulf %3, %5 : vector<128x128xf32>
    %7 = arith.addf %1, %6 : vector<128x128xf32>
    %c1 = arith.constant 1 : index
    %c0_5 = arith.constant 0 : index
    %8 = vector.load %arg3[%c1, %c0_5] : memref<2x128xf32, #tpu.memory_space<vmem>>, vector<1x128xf32>
    %9 = vector.broadcast %8 : vector<1x128xf32> to vector<128x128xf32>
    %10 = arith.addf %7, %9 : vector<128x128xf32>
    %c0_6 = arith.constant 0 : index
    %c0_7 = arith.constant 0 : index
    %11 = vector.load %arg4[%c0_6, %c0_7] : memref<128x128xf32, #tpu.memory_space<vmem>>, vector<128x128xf32>
    tpu.vector_store %arg4[%c0_6, %c0_7], %10 {strides = array<i32>} : memref<128x128xf32, #tpu.memory_space<vmem>>, vector<128x128xf32>,
    return
  }
  func.func @transform_0(%arg0: i32) -> (i32, i32) {
    %c0_i32 = arith.constant 0 : i32
    %c0_i32_0 = arith.constant 0 : i32
    return %arg0, %c0_i32 : i32, i32
  }
  func.func @transform_1(%arg0: i32) -> (i32, i32) {
    %c0_i32 = arith.constant 0 : i32
    %c0_i32_0 = arith.constant 0 : i32
    return %arg0, %c0_i32 : i32, i32
  }
  func.func @transform_2(%arg0: i32) -> (i32, i32) {
    %c0_i32 = arith.constant 0 : i32
    %c0_i32_0 = arith.constant 0 : i32
    %c0_i32_1 = arith.constant 0 : i32
    return %c0_i32, %c0_i32_0 : i32, i32
  }
  func.func @transform_3(%arg0: i32) -> (i32, i32) {
    %c0_i32 = arith.constant 0 : i32
    %c0_i32_0 = arith.constant 0 : i32
    return %arg0, %c0_i32 : i32, i32
  }
}

</mosaic_0001>

<bundles_post_ra>
// kernel: graphnet_feature.6
= control target key start
LH: loop header
LB: loop body
LE: loop exit
PB: predicated region body
PF: predicated region fallthrough
CT: control target
= control target key end

     0   :  { %v105_v0 = vmov 0.0   ;;  %s187_s1 = inlined_call_operand.vmem [shape: f32[1,128], index: 1, kind: output, shape index: {0}]   ;;  %s188_s2 = inlined_call_operand.vmem [shape: f32[1,128], index: 2, kind: output, shape index: {1}]   ;;  %s189_s0 = inlined_call_operand.vmem [shape: f32[128,128], index: 0, kind: input, shape index: {}]  }
   0x1   :  { %14 = vst [vmem:[%s187_s1] sm:$0x1] %v105_v0  ;;  %v16_v1 = vld [vmem:[%s189_s0] sm:$0xff]  ;;  %v17_v2 = vld [vmem:[%s189_s0 + $0x8] sm:$0xff]  ;;  %v18_v3 = vld [vmem:[%s189_s0 + $0x10] sm:$0xff] }
   0x2   :  { %15 = vst [vmem:[%s188_s2] sm:$0x1] %v105_v0  ;;  %v19_v4 = vld [vmem:[%s189_s0 + $0x18] sm:$0xff]  ;;  %v33_v5 = vadd.f32 %v17_v2, %v16_v1  ;;  %v57_v6 = vmul.f32 %v16_v1, %v16_v1  ;;  %v58_v7 = vmul.f32 %v17_v2, %v17_v2  ;;  %v59_v8 = vmul.f32 %v18_v3, %v18_v3  ;;  %v20_v9 = vld [vmem:[%s189_s0 + $0x20] sm:$0xff]  ;;  %v21_v13 = vld [vmem:[%s189_s0 + $0x28] sm:$0xff] }
   0x3   :  { %v60_v11 = vmul.f32 %v19_v4, %v19_v4  ;;  %v61_v15 = vmul.f32 %v20_v9, %v20_v9  ;;  %v22_v17 = vld [vmem:[%s189_s0 + $0x30] sm:$0xff]  ;;  %v62_v19 = vmul.f32 %v21_v13, %v21_v13  ;;  %v23_v21 = vld [vmem:[%s189_s0 + $0x38] sm:$0xff]  ;;  %v24_v25 = vld [vmem:[%s189_s0 + $0x40] sm:$0xff] }
   0x4   :  { %v34_v10 = vadd.f32 %v33_v5, %v18_v3  ;;  %v73_v12 = vadd.f32 %v58_v7, %v57_v6  ;;  %v63_v23 = vmul.f32 %v22_v17, %v22_v17  ;;  %v64_v27 = vmul.f32 %v23_v21, %v23_v21  ;;  %v25_v29 = vld [vmem:[%s189_s0 + $0x48] sm:$0xff]  ;;  %v26_v33 = vld [vmem:[%s189_s0 + $0x50] sm:$0xff]  ;;  %v27_v37 = vld [vmem:[%s189_s0 + $0x58] sm:$0xff] }
   0x5   :  { %v65_v31 = vmul.f32 %v24_v25, %v24_v25  ;;  %v66_v35 = vmul.f32 %v25_v29, %v25_v29  ;;  %v67_v39 = vmul.f32 %v26_v33, %v26_v33  ;;  %v28_v41 = vld [vmem:[%s189_s0 + $0x60] sm:$0xff]  ;;  %v68_v43 = vmul.f32 %v27_v37, %v27_v37  ;;  %v29_v45 = vld [vmem:[%s189_s0 + $0x68] sm:$0xff]  ;;  %v30_v49 = vld [vmem:[%s189_s0 + $0x70] sm:$0xff] }
   0x6   :  { %v35_v14 = vadd.f32 %v34_v10, %v19_v4  ;;  %v74_v16 = vadd.f32 %v73_v12, %v59_v8  ;;  %v69_v47 = vmul.f32 %v28_v41, %v28_v41  ;;  %v70_v51 = vmul.f32 %v29_v45, %v29_v45  ;;  %v31_v53 = vld [vmem:[%s189_s0 + $0x78] sm:$0xff] }
   0x7   :  { %v71_v55 = vmul.f32 %v30_v49, %v30_v49  ;;  %v72_v58 = vmul.f32 %v31_v53, %v31_v53 }
   0x8   :  { %v36_v18 = vadd.f32 %v35_v14, %v20_v9  ;;  %v75_v20 = vadd.f32 %v74_v16, %v60_v11  ;;  %v32_v7 = vld [vmem:[%s187_s1] sm:$0x1] }
   0x9   :  { %v56_v12 = vld [vmem:[%s188_s2] sm:$0x1] }
   0xa   :  { %v37_v22 = vadd.f32 %v36_v18, %v21_v13  ;;  %v76_v24 = vadd.f32 %v75_v20, %v61_v15 }
   0xc   :  { %v38_v26 = vadd.f32 %v37_v22, %v22_v17  ;;  %v77_v28 = vadd.f32 %v76_v24, %v62_v19 }
   0xe   :  { %v39_v30 = vadd.f32 %v38_v26, %v23_v21  ;;  %v78_v32 = vadd.f32 %v77_v28, %v63_v23 }
  0x10   :  { %v40_v34 = vadd.f32 %v39_v30, %v24_v25  ;;  %v79_v36 = vadd.f32 %v78_v32, %v64_v27 }
  0x12   :  { %v41_v38 = vadd.f32 %v40_v34, %v25_v29  ;;  %v80_v40 = vadd.f32 %v79_v36, %v65_v31 }
  0x14   :  { %v42_v42 = vadd.f32 %v41_v38, %v26_v33  ;;  %v81_v44 = vadd.f32 %v80_v40, %v66_v35 }
  0x16   :  { %v43_v46 = vadd.f32 %v42_v42, %v27_v37  ;;  %v82_v48 = vadd.f32 %v81_v44, %v67_v39 }
  0x18   :  { %v44_v50 = vadd.f32 %v43_v46, %v28_v41  ;;  %v83_v52 = vadd.f32 %v82_v48, %v68_v43 }
  0x1a   :  { %v45_v54 = vadd.f32 %v44_v50, %v29_v45  ;;  %v84_v56 = vadd.f32 %v83_v52, %v69_v47 }
  0x1c   :  { %v46_v57 = vadd.f32 %v45_v54, %v30_v49  ;;  %v85_v59 = vadd.f32 %v84_v56, %v70_v51 }
  0x1e   :  { %v47_v60 = vadd.f32 %v46_v57, %v31_v53  ;;  %v86_v61 = vadd.f32 %v85_v59, %v71_v55 }
  0x20   :  { %v48_v62 = vrot.slane %v47_v60, 4  ;;  %v87_v63 = vadd.f32 %v86_v61, %v72_v58 }
  0x22   :  { %v49_v0 = vadd.f32 %v48_v62, %v47_v60  ;;  %v88_v1 = vrot.slane %v87_v63, 4 }
  0x24   :  { %v50_v2 = vrot.slane %v49_v0, 2  ;;  %v89_v3 = vadd.f32 %v88_v1, %v87_v63 }
  0x26   :  { %v51_v4 = vadd.f32 %v50_v2, %v49_v0  ;;  %v90_v5 = vrot.slane %v89_v3, 2 }
  0x28   :  { %v52_v6 = vrot.slane %v51_v4, 1  ;;  %v91_v8 = vadd.f32 %v90_v5, %v89_v3 }
  0x2a   :  { %v53_v9 = vadd.f32 %v52_v6, %v51_v4  ;;  %v92_v10 = vrot.slane %v91_v8, 1 }
  0x2c   :  { %v54_v11 = vadd.f32 %v53_v9, %v32_v7  ;;  %v93_v13 = vadd.f32 %v92_v10, %v91_v8 }
  0x2e   :  { %55 = vst [vmem:[%s187_s1] sm:$0x1] %v54_v11  ;;  %v94_v14 = vadd.f32 %v93_v13, %v56_v12 }
  0x30   :  { %95 = vst [vmem:[%s188_s2] sm:$0x1] %v94_v14 }

// kernel: graphnet_feature.7
= control target key start
LH: loop header
LB: loop body
LE: loop exit
PB: predicated region body
PF: predicated region fallthrough
CT: control target
= control target key end

     0   :  { %s698_s2 = inlined_call_operand.vmem [shape: bf16[128,128], index: 2, kind: input, shape index: {}]   ;;  %s699_s0 = inlined_call_operand.vmem [shape: f32[128,128], index: 0, kind: input, shape index: {}]   ;;  %s700_s1 = inlined_call_operand.vmem [shape: f32[2,128], index: 1, kind: input, shape index: {}]   ;;  %s701_s3 = inlined_call_operand.vmem [shape: bf16[128,128], index: 3, kind: output, shape index: {0}]   ;;  %s702_s4 = inlined_call_operand.vmem [shape: bf16[128,128], index: 4, kind: output, shape index: {1}]  }
   0x1   :  { %v340_v0 = vld [vmem:[%s698_s2 + $0x38] sm:$0xff]  ;;  %v339_v1 = vld [vmem:[%s698_s2 + $0x30] sm:$0xff]  ;;  %v16_v2 = vld [vmem:[%s699_s0] sm:$0xff] }
   0x2   :  { %196 = vmatpush.bf16.msra.mxu0 %v340_v0  ;;  %435 = vmatpush.bf16.msra.mxu1 %v340_v0  ;;  %v17_v3 = vld [vmem:[%s699_s0 + $0x8] sm:$0xff]  ;;  %v501_v4 = vld [vmem:[%s700_s1] ss:$0 sm:$0xff]  ;;  %v506_v5 = vld [vmem:[%s700_s1 + $0x1] ss:$0 sm:$0xff] }
   0x3   :  { %436 = vmatpush.bf16.msra.mxu2 %v340_v0  ;;  %437 = vmatpush.bf16.msra.mxu3 %v340_v0  ;;  %v20_v6 = vld [vmem:[%s699_s0 + $0x20] sm:$0xff]  ;;  %v34_v7 = vmul.f32 %v501_v4, %v16_v2  ;;  %v35_v8 = vmul.f32 %v501_v4, %v17_v3  ;;  %v21_v9 = vld [vmem:[%s699_s0 + $0x28] sm:$0xff]  ;;  %v18_v29 = vld [vmem:[%s699_s0 + $0x10] sm:$0xff] }
   0x4   :  { %v38_v10 = vmul.f32 %v501_v4, %v20_v6  ;;  %v24_v11 = vld [vmem:[%s699_s0 + $0x40] sm:$0xff]  ;;  %v25_v12 = vld [vmem:[%s699_s0 + $0x48] sm:$0xff]  ;;  %v39_v14 = vmul.f32 %v501_v4, %v21_v9  ;;  %v19_v30 = vld [vmem:[%s699_s0 + $0x18] sm:$0xff]  ;;  %v36_v33 = vmul.f32 %v501_v4, %v18_v29 }
   0x5   :  { %v338_v13 = vld [vmem:[%s698_s2 + $0x28] sm:$0xff]  ;;  %v42_v15 = vmul.f32 %v501_v4, %v24_v11  ;;  %v43_v16 = vmul.f32 %v501_v4, %v25_v12  ;;  %v530_v17 = vadd.f32 %v506_v5, %v34_v7  ;;  %v533_v18 = vadd.f32 %v506_v5, %v35_v8  ;;  %v28_v19 = vld [vmem:[%s699_s0 + $0x60] sm:$0xff]  ;;  %v22_v34 = vld [vmem:[%s699_s0 + $0x30] sm:$0xff] }
   0x6   :  { %197 = vmatpush.bf16.msra.mxu0 %v339_v1  ;;  %438 = vmatpush.bf16.msra.mxu1 %v339_v1  ;;  %v539_v20 = vadd.f32 %v506_v5, %v38_v10  ;;  %v542_v21 = vadd.f32 %v506_v5, %v39_v14  ;;  %v29_v24 = vld [vmem:[%s699_s0 + $0x68] sm:$0xff]  ;;  %v337_v25 = vld [vmem:[%s698_s2 + $0x20] sm:$0xff]  ;;  %v46_v28 = vmul.f32 %v501_v4, %v28_v19  ;;  %v336_v35 = vld [vmem:[%s698_s2 + $0x18] sm:$0xff] }
   0x7   :  { %439 = vmatpush.bf16.msra.mxu2 %v339_v1  ;;  %440 = vmatpush.bf16.msra.mxu3 %v339_v1  ;;  %v344_v22 = vpack.c.bf16 %v533_v18, %v530_v17  ;;  %v547_v23 = vadd.f32 %v506_v5, %v42_v15  ;;  %v558_v27 = vadd.f32 %v506_v5, %v43_v16  ;;  %v23_v39 = vld [vmem:[%s699_s0 + $0x38] sm:$0xff]  ;;  %v26_v40 = vld [vmem:[%s699_s0 + $0x50] sm:$0xff]  ;;  %v334_v1 = vld [vmem:[%s698_s2 + $0x8] sm:$0xff] }
   0x8   :  { %v354_v26 = vpack.c.bf16 %v542_v21, %v539_v20  ;;  %v47_v32 = vmul.f32 %v501_v4, %v29_v24  ;;  %v64_v36 = vadd.f32 %v506_v5, %v46_v28  ;;  %v37_v38 = vmul.f32 %v501_v4, %v19_v30  ;;  %v27_v45 = vld [vmem:[%s699_s0 + $0x58] sm:$0xff]  ;;  %v30_v48 = vld [vmem:[%s699_s0 + $0x70] sm:$0xff] }
   0x9   :  { %345 = vst [vmem:[%s701_s3] sm:$0xff] %v344_v22   ;;  %v364_v31 = vpack.c.bf16 %v558_v27, %v547_v23  ;;  %v596_v42 = vadd.f32 %v506_v5, %v36_v33  ;;  %v40_v44 = vmul.f32 %v501_v4, %v22_v34  ;;  %v41_v46 = vmul.f32 %v501_v4, %v23_v39  ;;  %v335_v49 = vld [vmem:[%s698_s2 + $0x10] sm:$0xff]  ;;  %v31_v56 = vld [vmem:[%s699_s0 + $0x78] sm:$0xff] }
   0xa   :  { %198 = vmatpush.bf16.msra.mxu0 %v338_v13  ;;  %441 = vmatpush.bf16.msra.mxu1 %v338_v13  ;;  %422 = vst [vmem:[%s701_s3 + $0x10] sm:$0xff] %v354_v26   ;;  %v65_v37 = vadd.f32 %v506_v5, %v47_v32  ;;  %v599_v43 = vadd.f32 %v506_v5, %v37_v38 }
   0xb   :  { %442 = vmatpush.bf16.msra.mxu2 %v338_v13  ;;  %443 = vmatpush.bf16.msra.mxu3 %v338_v13  ;;  %424 = vst [vmem:[%s701_s3 + $0x20] sm:$0xff] %v364_v31   ;;  %v44_v47 = vmul.f32 %v501_v4, %v26_v40  ;;  %v68_v50 = vpack.c.bf16 %v530_v17, %v530_v17 }
   0xc   :  { %v374_v41 = vpack.c.bf16 %v65_v37, %v64_v36  ;;  %v69_v51 = vpack.c.bf16 %v533_v18, %v533_v18  ;;  %v349_v52 = vpack.c.bf16 %v599_v43, %v596_v42  ;;  %v623_v53 = vadd.f32 %v506_v5, %v40_v44 }
   0xd   :  { %v626_v54 = vadd.f32 %v506_v5, %v41_v46  ;;  %v45_v55 = vmul.f32 %v501_v4, %v27_v45  ;;  %v72_v57 = vpack.c.bf16 %v539_v20, %v539_v20  ;;  %v73_v58 = vpack.c.bf16 %v542_v21, %v542_v21 }
   0xe   :  { %199 = vmatpush.bf16.msra.mxu0 %v337_v25  ;;  %444 = vmatpush.bf16.msra.mxu1 %v337_v25  ;;  %426 = vst [vmem:[%s701_s3 + $0x30] sm:$0xff] %v374_v41   ;;  %v76_v59 = vpack.c.bf16 %v547_v23, %v547_v23  ;;  %v48_v60 = vmul.f32 %v501_v4, %v30_v48  ;;  %v116_v8 = vunpack.c.l.b16 %v68_v50  ;;  %v117_v11 = vunpack.c.l.b16 %v69_v51 }
   0xf   :  { %445 = vmatpush.bf16.msra.mxu2 %v337_v25  ;;  %446 = vmatpush.bf16.msra.mxu3 %v337_v25  ;;  %421 = vst [vmem:[%s701_s3 + $0x8] sm:$0xff] %v349_v52   ;;  %v77_v61 = vpack.c.bf16 %v558_v27, %v558_v27  ;;  %v359_v62 = vpack.c.bf16 %v626_v54, %v623_v53  ;;  %v120_v12 = vunpack.c.l.b16 %v72_v57  ;;  %v121_v13 = vunpack.c.l.b16 %v73_v58 }
  0x10   :  { %v62_v63 = vadd.f32 %v506_v5, %v44_v47  ;;  %v63_v0 = vadd.f32 %v506_v5, %v45_v55  ;;  %v80_v2 = vpack.c.bf16 %v64_v36, %v64_v36  ;;  %v81_v3 = vpack.c.bf16 %v65_v37, %v65_v37 }
  0x11   :  { %v49_v6 = vmul.f32 %v501_v4, %v31_v56  ;;  %423 = vst [vmem:[%s701_s3 + $0x18] sm:$0xff] %v359_v62   ;;  %v66_v9 = vadd.f32 %v506_v5, %v48_v60  ;;  %v124_v14 = vunpack.c.l.b16 %v76_v59  ;;  %v333_v4 = vld [vmem:[%s698_s2] sm:$0xff]  ;;  %v125_v15 = vunpack.c.l.b16 %v77_v61 }
  0x12   :  { %200 = vmatpush.bf16.msra.mxu0 %v336_v35  ;;  %447 = vmatpush.bf16.msra.mxu1 %v336_v35  ;;  %v369_v7 = vpack.c.bf16 %v63_v0, %v62_v63  ;;  %v128_v16 = vunpack.c.l.b16 %v80_v2  ;;  %v129_v17 = vunpack.c.l.b16 %v81_v3  ;;  %v134_v19 = vpack.c.b16 %v121_v13, %v120_v12 }
  0x13   :  { %448 = vmatpush.bf16.msra.mxu2 %v336_v35  ;;  %449 = vmatpush.bf16.msra.mxu3 %v336_v35  ;;  %v67_v10 = vadd.f32 %v506_v5, %v49_v6  ;;  %v132_v5 = vpack.c.b16 %v117_v11, %v116_v8  ;;  %v136_v20 = vpack.c.b16 %v125_v15, %v124_v14 }
  0x14   :  { %425 = vst [vmem:[%s701_s3 + $0x28] sm:$0xff] %v369_v7   ;;  %v138_v21 = vpack.c.b16 %v129_v17, %v128_v16  ;;  %v70_v22 = vpack.c.bf16 %v596_v42, %v596_v42  ;;  %v71_v23 = vpack.c.bf16 %v599_v43, %v599_v43  ;;  %v74_v24 = vpack.c.bf16 %v623_v53, %v623_v53 }
  0x15   :  { %v379_v18 = vpack.c.bf16 %v67_v10, %v66_v9  ;;  %v75_v25 = vpack.c.bf16 %v626_v54, %v626_v54  ;;  %v78_v26 = vpack.c.bf16 %v62_v63, %v62_v63  ;;  %v79_v27 = vpack.c.bf16 %v63_v0, %v63_v0 }
  0x16   :  { %201 = vmatpush.bf16.msra.mxu0 %v335_v49  ;;  %450 = vmatpush.bf16.msra.mxu1 %v335_v49  ;;  %v82_v28 = vpack.c.bf16 %v66_v9, %v66_v9  ;;  %v83_v29 = vpack.c.bf16 %v67_v10, %v67_v10  ;;  %v118_v30 = vunpack.c.l.b16 %v70_v22  ;;  %v119_v31 = vunpack.c.l.b16 %v71_v23 }
  0x17   :  { %451 = vmatpush.bf16.msra.mxu2 %v335_v49  ;;  %452 = vmatpush.bf16.msra.mxu3 %v335_v49  ;;  %427 = vst [vmem:[%s701_s3 + $0x38] sm:$0xff] %v379_v18   ;;  %v122_v32 = vunpack.c.l.b16 %v74_v24  ;;  %v123_v33 = vunpack.c.l.b16 %v75_v25  ;;  %v126_v34 = vunpack.c.l.b16 %v78_v26  ;;  %v127_v35 = vunpack.c.l.b16 %v79_v27 }
  0x18   :  { %v130_v36 = vunpack.c.l.b16 %v82_v28  ;;  %v131_v37 = vunpack.c.l.b16 %v83_v29  ;;  %v133_v38 = vpack.c.b16 %v119_v31, %v118_v30 }
  0x19   :  { %v135_v39 = vpack.c.b16 %v123_v33, %v122_v32  ;;  %v137_v40 = vpack.c.b16 %v127_v35, %v126_v34 }
  0x1a   :  { %202 = vmatpush.bf16.msra.mxu0 %v334_v1  ;;  %453 = vmatpush.bf16.msra.mxu1 %v334_v1  ;;  %v139_v41 = vpack.c.b16 %v131_v37, %v130_v36 }
  0x1b   :  { %454 = vmatpush.bf16.msra.mxu2 %v334_v1  ;;  %455 = vmatpush.bf16.msra.mxu3 %v334_v1 }
  0x1e   :  { %203 = vmatpush.bf16.msra.mxu0 %v333_v4  ;;  %456 = vmatpush.bf16.msra.mxu1 %v333_v4 }
  0x1f   :  { %457 = vmatpush.bf16.msra.mxu2 %v333_v4  ;;  %458 = vmatpush.bf16.msra.mxu3 %v333_v4 }
  0x21   :  { %204 = vmatmul.bf16.vlgmr.msra.gmra.mxu0 %v132_v5  ;;  %214 = vmatmul.bf16.vlgmr.msra.gmra.mxu1 %v134_v19 }
  0x22   :  { %224 = vmatmul.bf16.vlgmr.msra.gmra.mxu2 %v136_v20  ;;  %234 = vmatmul.bf16.vlgmr.msra.gmra.mxu3 %v138_v21 }
  0x31   :  { %209 = vmatmul.bf16.gmra.mxu0 %v133_v38  ;;  %219 = vmatmul.bf16.gmra.mxu1 %v135_v39 }
  0x32   :  { %229 = vmatmul.bf16.gmra.mxu2 %v137_v40  ;;  %239 = vmatmul.bf16.gmra.mxu3 %v139_v41 }
  0x9e   :  { %v205_v42 = vpop.f32.mrf.mxu0  ;;  %v215_v43 = vpop.f32.mrf.mxu1 }
  0xa5   :  { %v225_v44 = vpop.f32.mrf.mxu2  ;;  %v235_v45 = vpop.f32.mrf.mxu3 }
  0xa6   :  { %v207_v46 = vpop.f32.mrf.mxu0  ;;  %v217_v47 = vpop.f32.mrf.mxu1 }
  0xa7   :  { %v384_v48 = vpack.c.bf16 %v207_v46, %v205_v42  ;;  %v394_v49 = vpack.c.bf16 %v217_v47, %v215_v43 }
  0xa9   :  { %385 = vst [vmem:[%s702_s4] sm:$0xff] %v384_v48  }
  0xaa   :  { %429 = vst [vmem:[%s702_s4 + $0x10] sm:$0xff] %v394_v49  }
  0xad   :  { %v227_v50 = vpop.f32.mrf.mxu2  ;;  %v237_v51 = vpop.f32.mrf.mxu3 }
  0xae   :  { %v404_v52 = vpack.c.bf16 %v227_v50, %v225_v44  ;;  %v414_v53 = vpack.c.bf16 %v237_v51, %v235_v45  ;;  %v210_v54 = vpop.f32.mrf.mxu0  ;;  %v220_v55 = vpop.f32.mrf.mxu1 }
  0xb0   :  { %431 = vst [vmem:[%s702_s4 + $0x20] sm:$0xff] %v404_v52  }
  0xb1   :  { %433 = vst [vmem:[%s702_s4 + $0x30] sm:$0xff] %v414_v53  }
  0xb5   :  { %v230_v56 = vpop.f32.mrf.mxu2  ;;  %v240_v57 = vpop.f32.mrf.mxu3 }
  0xb6   :  { %v212_v58 = vpop.f32.mrf.mxu0  ;;  %v222_v59 = vpop.f32.mrf.mxu1 }
  0xb7   :  { %v389_v60 = vpack.c.bf16 %v212_v58, %v210_v54  ;;  %v399_v61 = vpack.c.bf16 %v222_v59, %v220_v55 }
  0xb9   :  { %428 = vst [vmem:[%s702_s4 + $0x8] sm:$0xff] %v389_v60  }
  0xba   :  { %430 = vst [vmem:[%s702_s4 + $0x18] sm:$0xff] %v399_v61  }
  0xbd   :  { %v232_v62 = vpop.f32.mrf.mxu2  ;;  %v242_v63 = vpop.f32.mrf.mxu3 }
  0xbe   :  { %v409_v0 = vpack.c.bf16 %v232_v62, %v230_v56  ;;  %v419_v1 = vpack.c.bf16 %v242_v63, %v240_v57 }
  0xc0   :  { %432 = vst [vmem:[%s702_s4 + $0x28] sm:$0xff] %v409_v0  }
  0xc1   :  { %434 = vst [vmem:[%s702_s4 + $0x38] sm:$0xff] %v419_v1  }

// kernel: graphnet_feature.11
= control target key start
LH: loop header
LB: loop body
LE: loop exit
PB: predicated region body
PF: predicated region fallthrough
CT: control target
= control target key end

     0   :  { %s388_s0 = inlined_call_operand.vmem [shape: bf16[128,128], index: 0, kind: input, shape index: {}]   ;;  %s389_s1 = inlined_call_operand.vmem [shape: bf16[128,128], index: 1, kind: input, shape index: {}]   ;;  %s390_s2 = inlined_call_operand.vmem [shape: f32[2,128], index: 2, kind: input, shape index: {}]   ;;  %s391_s3 = inlined_call_operand.vmem [shape: f32[128,128], index: 3, kind: output, shape index: {}]  }
   0x1   :  { %v151_v0 = vld [vmem:[%s388_s0] sm:$0xff]   ;;  %v214_v7 = vld [vmem:[%s388_s0 + $0x8] sm:$0xff]   ;;  %v215_v9 = vld [vmem:[%s388_s0 + $0x10] sm:$0xff]  }
   0x2   :  { %v183_v1 = vld [vmem:[%s389_s1] sm:$0xff]   ;;  %v152_v2 = vunpack.c.l.bf16 %v151_v0  ;;  %v153_v5 = vunpack.c.h.bf16 %v151_v0  ;;  %v221_v8 = vld [vmem:[%s389_s1 + $0x8] sm:$0xff]   ;;  %v156_v13 = vunpack.c.l.bf16 %v214_v7  ;;  %v222_v15 = vld [vmem:[%s389_s1 + $0x10] sm:$0xff]   ;;  %v157_v17 = vunpack.c.h.bf16 %v214_v7 }
   0x3   :  { %v184_v3 = vunpack.c.l.bf16 %v183_v1  ;;  %v259_v4 = vld [vmem:[%s390_s2] ss:$0 sm:$0xff]  ;;  %v185_v6 = vunpack.c.h.bf16 %v183_v1  ;;  %v274_v11 = vld [vmem:[%s390_s2 + $0x1] ss:$0 sm:$0xff]  ;;  %v188_v14 = vunpack.c.l.bf16 %v221_v8  ;;  %v216_v16 = vld [vmem:[%s388_s0 + $0x18] sm:$0xff]   ;;  %v189_v18 = vunpack.c.h.bf16 %v221_v8 }
   0x4   :  { %v160_v19 = vunpack.c.l.bf16 %v215_v9  ;;  %v192_v20 = vunpack.c.l.bf16 %v222_v15  ;;  %v223_v21 = vld [vmem:[%s389_s1 + $0x18] sm:$0xff]   ;;  %v161_v25 = vunpack.c.h.bf16 %v215_v9  ;;  %v193_v28 = vunpack.c.h.bf16 %v222_v15  ;;  %v217_v30 = vld [vmem:[%s388_s0 + $0x20] sm:$0xff]   ;;  %v218_v44 = vld [vmem:[%s388_s0 + $0x28] sm:$0xff]  }
   0x5   :  { %v80_v10 = vmul.f32 %v259_v4, %v184_v3  ;;  %v81_v12 = vmul.f32 %v259_v4, %v185_v6  ;;  %v82_v24 = vmul.f32 %v259_v4, %v188_v14  ;;  %v83_v26 = vmul.f32 %v259_v4, %v189_v18  ;;  %v224_v35 = vld [vmem:[%s389_s1 + $0x20] sm:$0xff]   ;;  %v225_v45 = vld [vmem:[%s389_s1 + $0x28] sm:$0xff]   ;;  %v219_v54 = vld [vmem:[%s388_s0 + $0x30] sm:$0xff]  }
   0x6   :  { %v84_v27 = vmul.f32 %v259_v4, %v192_v20  ;;  %v164_v29 = vunpack.c.l.bf16 %v216_v16  ;;  %v196_v34 = vunpack.c.l.bf16 %v223_v21  ;;  %v85_v38 = vmul.f32 %v259_v4, %v193_v28  ;;  %v226_v59 = vld [vmem:[%s389_s1 + $0x30] sm:$0xff]   ;;  %v227_v6 = vld [vmem:[%s389_s1 + $0x38] sm:$0xff]  }
   0x7   :  { %v96_v22 = vadd.f32 %v152_v2, %v80_v10  ;;  %v97_v23 = vadd.f32 %v153_v5, %v81_v12  ;;  %v98_v33 = vadd.f32 %v156_v13, %v82_v24  ;;  %v99_v36 = vadd.f32 %v157_v17, %v83_v26  ;;  %v220_v5 = vld [vmem:[%s388_s0 + $0x38] sm:$0xff]  }
   0x8   :  { %v100_v37 = vadd.f32 %v160_v19, %v84_v27  ;;  %v165_v39 = vunpack.c.h.bf16 %v216_v16  ;;  %v86_v41 = vmul.f32 %v259_v4, %v196_v34  ;;  %v197_v42 = vunpack.c.h.bf16 %v223_v21 }
   0x9   :  { %v114_v31 = vadd.f32 %v274_v11, %v96_v22  ;;  %v115_v32 = vadd.f32 %v274_v11, %v97_v23  ;;  %v116_v40 = vadd.f32 %v274_v11, %v98_v33  ;;  %v168_v43 = vunpack.c.l.bf16 %v217_v30 }
   0xa   :  { %v117_v46 = vadd.f32 %v274_v11, %v99_v36  ;;  %v118_v47 = vadd.f32 %v274_v11, %v100_v37  ;;  %v101_v48 = vadd.f32 %v161_v25, %v85_v38  ;;  %v200_v49 = vunpack.c.l.bf16 %v224_v35 }
   0xb   :  { %130 = vst [vmem:[%s391_s3] sm:$0xff] %v114_v31  ;;  %v102_v50 = vadd.f32 %v164_v29, %v86_v41  ;;  %v87_v51 = vmul.f32 %v259_v4, %v197_v42  ;;  %v169_v52 = vunpack.c.h.bf16 %v217_v30  ;;  %v201_v53 = vunpack.c.h.bf16 %v224_v35 }
   0xc   :  { %131 = vst [vmem:[%s391_s3 + $0x8] sm:$0xff] %v115_v32  ;;  %v119_v55 = vadd.f32 %v274_v11, %v101_v48  ;;  %v88_v56 = vmul.f32 %v259_v4, %v200_v49  ;;  %v172_v57 = vunpack.c.l.bf16 %v218_v44  ;;  %v204_v58 = vunpack.c.l.bf16 %v225_v45 }
   0xd   :  { %132 = vst [vmem:[%s391_s3 + $0x10] sm:$0xff] %v116_v40  ;;  %v120_v60 = vadd.f32 %v274_v11, %v102_v50  ;;  %v103_v61 = vadd.f32 %v165_v39, %v87_v51  ;;  %v89_v62 = vmul.f32 %v259_v4, %v201_v53  ;;  %v173_v63 = vunpack.c.h.bf16 %v218_v44 }
   0xe   :  { %133 = vst [vmem:[%s391_s3 + $0x18] sm:$0xff] %v117_v46  ;;  %v104_v0 = vadd.f32 %v168_v43, %v88_v56  ;;  %v90_v1 = vmul.f32 %v259_v4, %v204_v58  ;;  %v205_v2 = vunpack.c.h.bf16 %v225_v45  ;;  %v176_v3 = vunpack.c.l.bf16 %v219_v54 }
   0xf   :  { %134 = vst [vmem:[%s391_s3 + $0x20] sm:$0xff] %v118_v47  ;;  %v121_v7 = vadd.f32 %v274_v11, %v103_v61  ;;  %v105_v8 = vadd.f32 %v169_v52, %v89_v62  ;;  %v208_v9 = vunpack.c.l.bf16 %v226_v59  ;;  %v177_v10 = vunpack.c.h.bf16 %v219_v54 }
  0x10   :  { %135 = vst [vmem:[%s391_s3 + $0x28] sm:$0xff] %v119_v55  ;;  %v122_v12 = vadd.f32 %v274_v11, %v104_v0  ;;  %v106_v13 = vadd.f32 %v172_v57, %v90_v1  ;;  %v91_v14 = vmul.f32 %v259_v4, %v205_v2  ;;  %v209_v15 = vunpack.c.h.bf16 %v226_v59 }
  0x11   :  { %136 = vst [vmem:[%s391_s3 + $0x30] sm:$0xff] %v120_v60  ;;  %v123_v16 = vadd.f32 %v274_v11, %v105_v8  ;;  %v92_v17 = vmul.f32 %v259_v4, %v208_v9  ;;  %v180_v18 = vunpack.c.l.bf16 %v220_v5  ;;  %v212_v19 = vunpack.c.l.bf16 %v227_v6 }
  0x12   :  { %137 = vst [vmem:[%s391_s3 + $0x38] sm:$0xff] %v121_v7  ;;  %v124_v20 = vadd.f32 %v274_v11, %v106_v13  ;;  %v107_v21 = vadd.f32 %v173_v63, %v91_v14  ;;  %v93_v22 = vmul.f32 %v259_v4, %v209_v15  ;;  %v181_v25 = vunpack.c.h.bf16 %v220_v5 }
  0x13   :  { %138 = vst [vmem:[%s391_s3 + $0x40] sm:$0xff] %v122_v12  ;;  %v108_v23 = vadd.f32 %v176_v3, %v92_v17  ;;  %v94_v24 = vmul.f32 %v259_v4, %v212_v19  ;;  %v213_v26 = vunpack.c.h.bf16 %v227_v6 }
  0x14   :  { %139 = vst [vmem:[%s391_s3 + $0x48] sm:$0xff] %v123_v16  ;;  %v125_v27 = vadd.f32 %v274_v11, %v107_v21  ;;  %v109_v28 = vadd.f32 %v177_v10, %v93_v22 }
  0x15   :  { %140 = vst [vmem:[%s391_s3 + $0x50] sm:$0xff] %v124_v20  ;;  %v126_v29 = vadd.f32 %v274_v11, %v108_v23  ;;  %v110_v30 = vadd.f32 %v180_v18, %v94_v24  ;;  %v95_v31 = vmul.f32 %v259_v4, %v213_v26 }
  0x16   :  { %141 = vst [vmem:[%s391_s3 + $0x58] sm:$0xff] %v125_v27  ;;  %v127_v32 = vadd.f32 %v274_v11, %v109_v28 }
  0x17   :  { %142 = vst [vmem:[%s391_s3 + $0x60] sm:$0xff] %v126_v29  ;;  %v128_v33 = vadd.f32 %v274_v11, %v110_v30  ;;  %v111_v34 = vadd.f32 %v181_v25, %v95_v31 }
  0x18   :  { %143 = vst [vmem:[%s391_s3 + $0x68] sm:$0xff] %v127_v32 }
  0x19   :  { %144 = vst [vmem:[%s391_s3 + $0x70] sm:$0xff] %v128_v33  ;;  %v129_v4 = vadd.f32 %v274_v11, %v111_v34 }
  0x1b   :  { %145 = vst [vmem:[%s391_s3 + $0x78] sm:$0xff] %v129_v4 }

// kernel: graphnet_feature.9
= control target key start
LH: loop header
LB: loop body
LE: loop exit
PB: predicated region body
PF: predicated region fallthrough
CT: control target
= control target key end

     0   :  { %s525_s2 = inlined_call_operand.vmem [shape: bf16[128,128], index: 2, kind: input, shape index: {}]   ;;  %s526_s1 = inlined_call_operand.vmem [shape: f32[2,128], index: 1, kind: input, shape index: {}]   ;;  %s527_s0 = inlined_call_operand.vmem [shape: bf16[128,128], index: 0, kind: input, shape index: {}]   ;;  %s528_s3 = inlined_call_operand.vmem [shape: bf16[128,128], index: 3, kind: output, shape index: {}]  }
   0x1   :  { %v278_v0 = vld [vmem:[%s525_s2 + $0x38] sm:$0xff]  ;;  %v277_v1 = vld [vmem:[%s525_s2 + $0x30] sm:$0xff]  ;;  %v276_v2 = vld [vmem:[%s525_s2 + $0x28] sm:$0xff] }
   0x2   :  { %154 = vmatpush.bf16.msra.mxu0 %v278_v0  ;;  %365 = vmatpush.bf16.msra.mxu1 %v278_v0  ;;  %v275_v3 = vld [vmem:[%s525_s2 + $0x20] sm:$0xff]  ;;  %v274_v5 = vld [vmem:[%s525_s2 + $0x18] sm:$0xff]  ;;  %v352_v6 = vld [vmem:[%s527_s0 + $0x10] sm:$0xff]  }
   0x3   :  { %366 = vmatpush.bf16.msra.mxu2 %v278_v0  ;;  %367 = vmatpush.bf16.msra.mxu3 %v278_v0  ;;  %v280_v4 = vld [vmem:[%s527_s0] sm:$0xff]   ;;  %v356_v8 = vld [vmem:[%s527_s0 + $0x30] sm:$0xff]   ;;  %v289_v12 = vunpack.c.l.bf16 %v352_v6  ;;  %v290_v13 = vunpack.c.h.bf16 %v352_v6  ;;  %v272_v25 = vld [vmem:[%s525_s2 + $0x8] sm:$0xff] }
   0x4   :  { %v354_v7 = vld [vmem:[%s527_s0 + $0x20] sm:$0xff]   ;;  %v281_v9 = vunpack.c.l.bf16 %v280_v4  ;;  %v282_v11 = vunpack.c.h.bf16 %v280_v4  ;;  %v273_v15 = vld [vmem:[%s525_s2 + $0x10] sm:$0xff]  ;;  %v305_v17 = vunpack.c.l.bf16 %v356_v8  ;;  %v306_v18 = vunpack.c.h.bf16 %v356_v8  ;;  %v351_v42 = vld [vmem:[%s527_s0 + $0x8] sm:$0xff]  }
   0x5   :  { %v441_v10 = vld [vmem:[%s526_s1] ss:$0 sm:$0xff]  ;;  %v297_v14 = vunpack.c.l.bf16 %v354_v7  ;;  %v298_v16 = vunpack.c.h.bf16 %v354_v7  ;;  %v450_v20 = vld [vmem:[%s526_s1 + $0x1] ss:$0 sm:$0xff]  ;;  %v353_v43 = vld [vmem:[%s527_s0 + $0x18] sm:$0xff]   ;;  %v285_v46 = vunpack.c.l.bf16 %v351_v42  ;;  %v286_v47 = vunpack.c.h.bf16 %v351_v42 }
   0x6   :  { %155 = vmatpush.bf16.msra.mxu0 %v277_v1  ;;  %368 = vmatpush.bf16.msra.mxu1 %v277_v1  ;;  %v48_v19 = vmul.f32 %v441_v10, %v281_v9  ;;  %v49_v21 = vmul.f32 %v441_v10, %v282_v11  ;;  %v52_v22 = vmul.f32 %v441_v10, %v289_v12  ;;  %v271_v34 = vld [vmem:[%s525_s2] sm:$0xff]  ;;  %v355_v44 = vld [vmem:[%s527_s0 + $0x28] sm:$0xff]   ;;  %v357_v45 = vld [vmem:[%s527_s0 + $0x38] sm:$0xff]   ;;  %v293_v48 = vunpack.c.l.bf16 %v353_v43 }
   0x7   :  { %369 = vmatpush.bf16.msra.mxu2 %v277_v1  ;;  %370 = vmatpush.bf16.msra.mxu3 %v277_v1  ;;  %v53_v23 = vmul.f32 %v441_v10, %v290_v13  ;;  %v56_v24 = vmul.f32 %v441_v10, %v297_v14  ;;  %v57_v26 = vmul.f32 %v441_v10, %v298_v16  ;;  %v294_v49 = vunpack.c.h.bf16 %v353_v43 }
   0x8   :  { %v60_v27 = vmul.f32 %v441_v10, %v305_v17  ;;  %v61_v28 = vmul.f32 %v441_v10, %v306_v18  ;;  %v66_v29 = vadd.f32 %v450_v20, %v48_v19  ;;  %v67_v30 = vadd.f32 %v450_v20, %v49_v21 }
   0x9   :  { %v70_v31 = vadd.f32 %v450_v20, %v52_v22  ;;  %v71_v32 = vadd.f32 %v450_v20, %v53_v23  ;;  %v74_v33 = vadd.f32 %v450_v20, %v56_v24  ;;  %v75_v35 = vadd.f32 %v450_v20, %v57_v26 }
   0xa   :  { %156 = vmatpush.bf16.msra.mxu0 %v276_v2  ;;  %371 = vmatpush.bf16.msra.mxu1 %v276_v2  ;;  %v78_v36 = vadd.f32 %v450_v20, %v60_v27  ;;  %v79_v37 = vadd.f32 %v450_v20, %v61_v28  ;;  %v82_v38 = vpack.c.bf16 %v67_v30, %v66_v29  ;;  %v301_v50 = vunpack.c.l.bf16 %v355_v44 }
   0xb   :  { %372 = vmatpush.bf16.msra.mxu2 %v276_v2  ;;  %373 = vmatpush.bf16.msra.mxu3 %v276_v2  ;;  %v84_v39 = vpack.c.bf16 %v71_v32, %v70_v31  ;;  %v86_v40 = vpack.c.bf16 %v75_v35, %v74_v33  ;;  %v302_v51 = vunpack.c.h.bf16 %v355_v44  ;;  %v309_v52 = vunpack.c.l.bf16 %v357_v45 }
   0xc   :  { %v88_v41 = vpack.c.bf16 %v79_v37, %v78_v36  ;;  %v310_v53 = vunpack.c.h.bf16 %v357_v45  ;;  %v50_v54 = vmul.f32 %v441_v10, %v285_v46  ;;  %v51_v55 = vmul.f32 %v441_v10, %v286_v47 }
   0xd   :  { %v54_v56 = vmul.f32 %v441_v10, %v293_v48  ;;  %v55_v57 = vmul.f32 %v441_v10, %v294_v49  ;;  %v58_v58 = vmul.f32 %v441_v10, %v301_v50  ;;  %v59_v59 = vmul.f32 %v441_v10, %v302_v51 }
   0xe   :  { %157 = vmatpush.bf16.msra.mxu0 %v275_v3  ;;  %374 = vmatpush.bf16.msra.mxu1 %v275_v3  ;;  %v62_v60 = vmul.f32 %v441_v10, %v309_v52  ;;  %v63_v61 = vmul.f32 %v441_v10, %v310_v53  ;;  %v68_v62 = vadd.f32 %v450_v20, %v50_v54 }
   0xf   :  { %375 = vmatpush.bf16.msra.mxu2 %v275_v3  ;;  %376 = vmatpush.bf16.msra.mxu3 %v275_v3  ;;  %v69_v63 = vadd.f32 %v450_v20, %v51_v55  ;;  %v72_v0 = vadd.f32 %v450_v20, %v54_v56  ;;  %v73_v1 = vadd.f32 %v450_v20, %v55_v57 }
  0x10   :  { %v76_v2 = vadd.f32 %v450_v20, %v58_v58  ;;  %v77_v3 = vadd.f32 %v450_v20, %v59_v59  ;;  %v80_v4 = vadd.f32 %v450_v20, %v62_v60 }
  0x11   :  { %v83_v6 = vpack.c.bf16 %v69_v63, %v68_v62  ;;  %v85_v7 = vpack.c.bf16 %v73_v1, %v72_v0 }
  0x12   :  { %158 = vmatpush.bf16.msra.mxu0 %v274_v5  ;;  %377 = vmatpush.bf16.msra.mxu1 %v274_v5  ;;  %v87_v8 = vpack.c.bf16 %v77_v3, %v76_v2 }
  0x13   :  { %378 = vmatpush.bf16.msra.mxu2 %v274_v5  ;;  %379 = vmatpush.bf16.msra.mxu3 %v274_v5  ;;  %v81_v5 = vadd.f32 %v450_v20, %v63_v61 }
  0x15   :  { %v89_v9 = vpack.c.bf16 %v81_v5, %v80_v4 }
  0x16   :  { %159 = vmatpush.bf16.msra.mxu0 %v273_v15  ;;  %380 = vmatpush.bf16.msra.mxu1 %v273_v15 }
  0x17   :  { %381 = vmatpush.bf16.msra.mxu2 %v273_v15  ;;  %382 = vmatpush.bf16.msra.mxu3 %v273_v15 }
  0x1a   :  { %160 = vmatpush.bf16.msra.mxu0 %v272_v25  ;;  %383 = vmatpush.bf16.msra.mxu1 %v272_v25 }
  0x1b   :  { %384 = vmatpush.bf16.msra.mxu2 %v272_v25  ;;  %385 = vmatpush.bf16.msra.mxu3 %v272_v25 }
  0x1e   :  { %161 = vmatpush.bf16.msra.mxu0 %v271_v34  ;;  %386 = vmatpush.bf16.msra.mxu1 %v271_v34 }
  0x1f   :  { %387 = vmatpush.bf16.msra.mxu2 %v271_v34  ;;  %388 = vmatpush.bf16.msra.mxu3 %v271_v34 }
  0x21   :  { %162 = vmatmul.bf16.vlgmr.msra.gmra.mxu0 %v82_v38  ;;  %172 = vmatmul.bf16.vlgmr.msra.gmra.mxu1 %v84_v39 }
  0x22   :  { %182 = vmatmul.bf16.vlgmr.msra.gmra.mxu2 %v86_v40  ;;  %192 = vmatmul.bf16.vlgmr.msra.gmra.mxu3 %v88_v41 }
  0x31   :  { %167 = vmatmul.bf16.gmra.mxu0 %v83_v6  ;;  %177 = vmatmul.bf16.gmra.mxu1 %v85_v7 }
  0x32   :  { %187 = vmatmul.bf16.gmra.mxu2 %v87_v8  ;;  %197 = vmatmul.bf16.gmra.mxu3 %v89_v9 }
  0x9e   :  { %v163_v10 = vpop.f32.mrf.mxu0  ;;  %v173_v11 = vpop.f32.mrf.mxu1 }
  0xa5   :  { %v183_v12 = vpop.f32.mrf.mxu2  ;;  %v193_v13 = vpop.f32.mrf.mxu3 }
  0xa6   :  { %v165_v14 = vpop.f32.mrf.mxu0  ;;  %v175_v15 = vpop.f32.mrf.mxu1 }
  0xa7   :  { %v314_v16 = vpack.c.bf16 %v165_v14, %v163_v10  ;;  %v324_v17 = vpack.c.bf16 %v175_v15, %v173_v11 }
  0xa9   :  { %315 = vst [vmem:[%s528_s3] sm:$0xff] %v314_v16  }
  0xaa   :  { %359 = vst [vmem:[%s528_s3 + $0x10] sm:$0xff] %v324_v17  }
  0xad   :  { %v185_v18 = vpop.f32.mrf.mxu2  ;;  %v195_v19 = vpop.f32.mrf.mxu3 }
  0xae   :  { %v334_v20 = vpack.c.bf16 %v185_v18, %v183_v12  ;;  %v344_v21 = vpack.c.bf16 %v195_v19, %v193_v13  ;;  %v168_v22 = vpop.f32.mrf.mxu0  ;;  %v178_v23 = vpop.f32.mrf.mxu1 }
  0xb0   :  { %361 = vst [vmem:[%s528_s3 + $0x20] sm:$0xff] %v334_v20  }
  0xb1   :  { %363 = vst [vmem:[%s528_s3 + $0x30] sm:$0xff] %v344_v21  }
  0xb5   :  { %v188_v24 = vpop.f32.mrf.mxu2  ;;  %v198_v25 = vpop.f32.mrf.mxu3 }
  0xb6   :  { %v170_v26 = vpop.f32.mrf.mxu0  ;;  %v180_v27 = vpop.f32.mrf.mxu1 }
  0xb7   :  { %v319_v28 = vpack.c.bf16 %v170_v26, %v168_v22  ;;  %v329_v29 = vpack.c.bf16 %v180_v27, %v178_v23 }
  0xb9   :  { %358 = vst [vmem:[%s528_s3 + $0x8] sm:$0xff] %v319_v28  }
  0xba   :  { %360 = vst [vmem:[%s528_s3 + $0x18] sm:$0xff] %v329_v29  }
  0xbd   :  { %v190_v30 = vpop.f32.mrf.mxu2  ;;  %v200_v31 = vpop.f32.mrf.mxu3 }
  0xbe   :  { %v339_v32 = vpack.c.bf16 %v190_v30, %v188_v24  ;;  %v349_v33 = vpack.c.bf16 %v200_v31, %v198_v25 }
  0xc0   :  { %362 = vst [vmem:[%s528_s3 + $0x28] sm:$0xff] %v339_v32  }
  0xc1   :  { %364 = vst [vmem:[%s528_s3 + $0x38] sm:$0xff] %v349_v33  }

// kernel: graphnet_feature.8
= control target key start
LH: loop header
LB: loop body
LE: loop exit
PB: predicated region body
PF: predicated region fallthrough
CT: control target
= control target key end

     0   :  { %v53_v16 = vlaneseq  ;;  %s750_s2 = inlined_call_operand.vmem [shape: bf16[128,128], index: 2, kind: input, shape index: {}]   ;;  %s751_s3 = inlined_call_operand.vmem [shape: f32[1,128], index: 3, kind: input, shape index: {}]   ;;  %s752_s1 = inlined_call_operand.vmem [shape: bf16[128,128], index: 1, kind: input, shape index: {}]   ;;  %s753_s0 = inlined_call_operand.<no memory space> [shape: s32[1], index: 0, kind: input, shape index: {}]   ;;  %s754_s4 = inlined_call_operand.vmem [shape: bf16[128,128], index: 4, kind: output, shape index: {0}]   ;;  %s755_s5 = inlined_call_operand.vmem [shape: f32[1,2,128], index: 5, kind: output, shape index: {1}]  }
   0x1   :  { %v466_v0 = vld [vmem:[%s750_s2 + $0x38] sm:$0xff]  ;;  %v465_v1 = vld [vmem:[%s750_s2 + $0x30] sm:$0xff]  ;;  %v464_v2 = vld [vmem:[%s750_s2 + $0x28] sm:$0xff]  ;;  %v630_v24 = vstv %s753_s0 }
   0x2   :  { %188 = vmatpush.bf16.msra.mxu0 %v466_v0  ;;  %514 = vmatpush.bf16.msra.mxu1 %v466_v0  ;;  %v463_v3 = vld [vmem:[%s750_s2 + $0x20] sm:$0xff]  ;;  %v462_v4 = vld [vmem:[%s750_s2 + $0x18] sm:$0xff]  ;;  %v461_v5 = vld [vmem:[%s750_s2 + $0x10] sm:$0xff]  ;;  %v622_v20 = vshrl.u32 %v53_v16, 7 }
   0x3   :  { %515 = vmatpush.bf16.msra.mxu2 %v466_v0  ;;  %516 = vmatpush.bf16.msra.mxu3 %v466_v0  ;;  %v460_v6 = vld [vmem:[%s750_s2 + $0x8] sm:$0xff]  ;;  %v459_v7 = vld [vmem:[%s750_s2] sm:$0xff]  ;;  %v453_v9 = vld [vmem:[%s752_s1 + $0x10] sm:$0xff] }
   0x4   :  { %v451_v8 = vld [vmem:[%s752_s1] sm:$0xff]  ;;  %v457_v11 = vld [vmem:[%s752_s1 + $0x30] sm:$0xff]  ;;  %v452_v12 = vld [vmem:[%s752_s1 + $0x8] sm:$0xff]  ;;  %v58_v22 = vadd.s32 32, %v622_v20  ;;  %v55_v25 = vadd.s32 8, %v622_v20  ;;  %v59_v26 = vadd.s32 40, %v622_v20  ;;  %vm254_vm1 = vcmp.lt.s32.totalorder %v622_v20, %v630_v24 }
   0x5   :  { %v455_v10 = vld [vmem:[%s752_s1 + $0x20] sm:$0xff]  ;;  %v454_v13 = vld [vmem:[%s752_s1 + $0x18] sm:$0xff]  ;;  %v456_v14 = vld [vmem:[%s752_s1 + $0x28] sm:$0xff]  ;;  %v62_v35 = vadd.s32 64, %v622_v20  ;;  %v63_v41 = vadd.s32 72, %v622_v20  ;;  %v66_v42 = vadd.s32 96, %v622_v20 }
   0x6   :  { %189 = vmatpush.bf16.msra.mxu0 %v465_v1  ;;  %517 = vmatpush.bf16.msra.mxu1 %v465_v1  ;;  %v458_v15 = vld [vmem:[%s752_s1 + $0x38] sm:$0xff]  ;;  %v620_v19 = vld [vmem:[%s751_s3] ss:$0 sm:$0xff]  ;;  %vm258_vm0 = vcmp.lt.s32.totalorder %v58_v22, %v630_v24  ;;  %vm255_vm2 = vcmp.lt.s32.totalorder %v55_v25, %v630_v24  ;;  %vm259_vm3 = vcmp.lt.s32.totalorder %v59_v26, %v630_v24  ;;  %v67_v46 = vadd.s32 104, %v622_v20 }
   0x7   :  { %518 = vmatpush.bf16.msra.mxu2 %v465_v1  ;;  %519 = vmatpush.bf16.msra.mxu3 %v465_v1  ;;  %v56_v50 = vadd.s32 16, %v622_v20  ;;  %vm262_vm4 = vcmp.lt.s32.totalorder %v62_v35, %v630_v24  ;;  %vm266_vm5 = vcmp.lt.s32.totalorder %v66_v42, %v630_v24  ;;  %vm263_vm6 = vcmp.lt.s32.totalorder %v63_v41, %v630_v24 }
   0x8   :  { %vm267_vm7 = vcmp.lt.s32.totalorder %v67_v46, %v630_v24  ;;  %v60_v63 = vadd.s32 48, %v622_v20 }
   0x9   :  { %vm256_vm8 = vcmp.lt.s32.totalorder %v56_v50, %v630_v24 }
   0xa   :  { %190 = vmatpush.bf16.msra.mxu0 %v464_v2  ;;  %520 = vmatpush.bf16.msra.mxu1 %v464_v2  ;;  %vm260_vm9 = vcmp.lt.s32.totalorder %v60_v63, %v630_v24 }
   0xb   :  { %521 = vmatpush.bf16.msra.mxu2 %v464_v2  ;;  %522 = vmatpush.bf16.msra.mxu3 %v464_v2 }
   0xe   :  { %191 = vmatpush.bf16.msra.mxu0 %v463_v3  ;;  %523 = vmatpush.bf16.msra.mxu1 %v463_v3 }
   0xf   :  { %524 = vmatpush.bf16.msra.mxu2 %v463_v3  ;;  %525 = vmatpush.bf16.msra.mxu3 %v463_v3  ;;  %v57_v3 = vadd.s32 24, %v622_v20 }
  0x11   :  { %vm257_vm10 = vcmp.lt.s32.totalorder %v57_v3, %v630_v24 }
  0x12   :  { %192 = vmatpush.bf16.msra.mxu0 %v462_v4  ;;  %526 = vmatpush.bf16.msra.mxu1 %v462_v4 }
  0x13   :  { %527 = vmatpush.bf16.msra.mxu2 %v462_v4  ;;  %528 = vmatpush.bf16.msra.mxu3 %v462_v4 }
  0x16   :  { %193 = vmatpush.bf16.msra.mxu0 %v461_v5  ;;  %529 = vmatpush.bf16.msra.mxu1 %v461_v5 }
  0x17   :  { %530 = vmatpush.bf16.msra.mxu2 %v461_v5  ;;  %531 = vmatpush.bf16.msra.mxu3 %v461_v5 }
  0x1a   :  { %194 = vmatpush.bf16.msra.mxu0 %v460_v6  ;;  %532 = vmatpush.bf16.msra.mxu1 %v460_v6 }
  0x1b   :  { %533 = vmatpush.bf16.msra.mxu2 %v460_v6  ;;  %534 = vmatpush.bf16.msra.mxu3 %v460_v6 }
  0x1e   :  { %195 = vmatpush.bf16.msra.mxu0 %v459_v7  ;;  %535 = vmatpush.bf16.msra.mxu1 %v459_v7 }
  0x1f   :  { %536 = vmatpush.bf16.msra.mxu2 %v459_v7  ;;  %537 = vmatpush.bf16.msra.mxu3 %v459_v7 }
  0x21   :  { %196 = vmatmul.bf16.vlgmr.msra.gmra.mxu0 %v451_v8  ;;  %206 = vmatmul.bf16.vlgmr.msra.gmra.mxu1 %v453_v9  ;;  %v61_v8 = vadd.s32 56, %v622_v20 }
  0x22   :  { %216 = vmatmul.bf16.vlgmr.msra.gmra.mxu2 %v455_v10  ;;  %226 = vmatmul.bf16.vlgmr.msra.gmra.mxu3 %v457_v11  ;;  %v64_v11 = vadd.s32 80, %v622_v20 }
  0x23   :  { %vm261_vm11 = vcmp.lt.s32.totalorder %v61_v8, %v630_v24 }
  0x24   :  { %vm264_vm12 = vcmp.lt.s32.totalorder %v64_v11, %v630_v24 }
  0x31   :  { %201 = vmatmul.bf16.gmra.mxu0 %v452_v12  ;;  %211 = vmatmul.bf16.gmra.mxu1 %v454_v13 }
  0x32   :  { %221 = vmatmul.bf16.gmra.mxu2 %v456_v14  ;;  %231 = vmatmul.bf16.gmra.mxu3 %v458_v15 }
  0x9e   :  { %v197_v17 = vpop.f32.mrf.mxu0  ;;  %v207_v18 = vpop.f32.mrf.mxu1 }
  0x9f   :  { %v208_v21 = vadd.f32 %v620_v19, %v207_v18  ;;  %v198_v23 = vadd.f32 %v620_v19, %v197_v17  ;;  %v68_v18 = vadd.s32 112, %v622_v20 }
  0xa1   :  { %v241_v27 = vmax.f32 %v208_v21, 0.0  ;;  %v237_v32 = vmax.f32 %v198_v23, 0.0  ;;  %vm268_vm13 = vcmp.lt.s32.totalorder %v68_v18, %v630_v24 }
  0xa3   :  { %v643_v37 = vsel %vm258_vm0, %v241_v27, 0.0  ;;  %v270_v43 = vsel %vm254_vm1, %v237_v32, 0.0  ;;  %vm376_vm0 = vcmask 1040384  }
  0xa4   :  { %v339_v14 = vmul.f32 %v270_v43, %v270_v43 }
  0xa5   :  { %v217_v28 = vpop.f32.mrf.mxu2  ;;  %v227_v29 = vpop.f32.mrf.mxu3 }
  0xa6   :  { %v199_v30 = vpop.f32.mrf.mxu0  ;;  %v209_v31 = vpop.f32.mrf.mxu1  ;;  %v218_v36 = vadd.f32 %v620_v19, %v217_v28  ;;  %v228_v40 = vadd.f32 %v620_v19, %v227_v29  ;;  %v65_v28 = vadd.s32 88, %v622_v20 }
  0xa7   :  { %v200_v33 = vadd.f32 %v620_v19, %v199_v30  ;;  %v210_v34 = vadd.f32 %v620_v19, %v209_v31 }
  0xa8   :  { %v245_v49 = vmax.f32 %v218_v36, 0.0  ;;  %v249_v52 = vmax.f32 %v228_v40, 0.0  ;;  %vm265_vm14 = vcmp.lt.s32.totalorder %v65_v28, %v630_v24 }
  0xa9   :  { %v238_v38 = vmax.f32 %v200_v33, 0.0  ;;  %v242_v39 = vmax.f32 %v210_v34, 0.0  ;;  %v69_v34 = vadd.s32 120, %v622_v20 }
  0xaa   :  { %v667_v59 = vsel %vm262_vm4, %v245_v49, 0.0  ;;  %v672_v1 = vsel %vm266_vm5, %v249_v52, 0.0 }
  0xab   :  { %v271_v44 = vsel %vm255_vm2, %v238_v38, 0.0  ;;  %v648_v45 = vsel %vm259_vm3, %v242_v39, 0.0  ;;  %vm269_vm15 = vcmp.lt.s32.totalorder %v69_v34, %v630_v24 }
  0xac   :  { %v470_v47 = vpack.c.bf16 %v271_v44, %v270_v43  ;;  %v480_v48 = vpack.c.bf16 %v648_v45, %v643_v37  ;;  %v340_v7 = vmul.f32 %v271_v44, %v271_v44  ;;  %v318_v26 = vadd.f32 %v271_v44, %v270_v43 }
  0xad   :  { %v219_v51 = vpop.f32.mrf.mxu2  ;;  %v229_v53 = vpop.f32.mrf.mxu3  ;;  %v343_v44 = vmul.f32 %v643_v37, %v643_v37 }
  0xae   :  { %471 = vst [vmem:[%s754_s4] sm:$0xff] %v470_v47   ;;  %v202_v54 = vpop.f32.mrf.mxu0  ;;  %v212_v55 = vpop.f32.mrf.mxu1  ;;  %v220_v56 = vadd.f32 %v620_v19, %v219_v51  ;;  %v230_v57 = vadd.f32 %v620_v19, %v229_v53  ;;  %v355_v27 = vadd.f32 %v340_v7, %v339_v14  ;;  %v344_v51 = vmul.f32 %v648_v45, %v648_v45 }
  0xaf   :  { %508 = vst [vmem:[%s754_s4 + $0x10] sm:$0xff] %v480_v48   ;;  %v203_v58 = vadd.f32 %v620_v19, %v202_v54  ;;  %v213_v0 = vadd.f32 %v620_v19, %v212_v55 }
  0xb0   :  { %v246_v60 = vmax.f32 %v220_v56, 0.0  ;;  %v250_v61 = vmax.f32 %v230_v57, 0.0 }
  0xb1   :  { %v239_v62 = vmax.f32 %v203_v58, 0.0  ;;  %v243_v10 = vmax.f32 %v213_v0, 0.0 }
  0xb2   :  { %v674_v2 = vsel %vm263_vm6, %v246_v60, 0.0  ;;  %v677_v4 = vsel %vm267_vm7, %v250_v61, 0.0 }
  0xb3   :  { %v272_v5 = vsel %vm256_vm8, %v239_v62, 0.0  ;;  %v490_v6 = vpack.c.bf16 %v674_v2, %v667_v59  ;;  %v500_v9 = vpack.c.bf16 %v677_v4, %v672_v1  ;;  %v276_v29 = vsel %vm260_vm9, %v243_v10, 0.0 }
  0xb4   :  { %v341_v15 = vmul.f32 %v272_v5, %v272_v5  ;;  %v319_v32 = vadd.f32 %v318_v26, %v272_v5  ;;  %v345_v56 = vmul.f32 %v276_v29, %v276_v29  ;;  %v348_v24 = vmul.f32 %v674_v2, %v674_v2 }
  0xb5   :  { %510 = vst [vmem:[%s754_s4 + $0x20] sm:$0xff] %v490_v6   ;;  %v222_v12 = vpop.f32.mrf.mxu2  ;;  %v232_v13 = vpop.f32.mrf.mxu3  ;;  %v352_v18 = vmul.f32 %v677_v4, %v677_v4 }
  0xb6   :  { %v204_v16 = vpop.f32.mrf.mxu0  ;;  %v214_v17 = vpop.f32.mrf.mxu1  ;;  %512 = vst [vmem:[%s754_s4 + $0x30] sm:$0xff] %v500_v9   ;;  %v223_v23 = vadd.f32 %v620_v19, %v222_v12  ;;  %v233_v25 = vadd.f32 %v620_v19, %v232_v13  ;;  %v356_v33 = vadd.f32 %v355_v27, %v341_v15 }
  0xb7   :  { %v205_v21 = vadd.f32 %v620_v19, %v204_v16  ;;  %v215_v22 = vadd.f32 %v620_v19, %v214_v17 }
  0xb8   :  { %v247_v38 = vmax.f32 %v223_v23, 0.0  ;;  %v251_v39 = vmax.f32 %v233_v25, 0.0 }
  0xb9   :  { %v240_v30 = vmax.f32 %v205_v21, 0.0  ;;  %v244_v31 = vmax.f32 %v215_v22, 0.0 }
  0xba   :  { %v280_v52 = vsel %vm264_vm12, %v247_v38, 0.0  ;;  %v284_v53 = vsel %vm268_vm13, %v251_v39, 0.0 }
  0xbb   :  { %v273_v35 = vsel %vm257_vm10, %v240_v30, 0.0  ;;  %v277_v36 = vsel %vm261_vm11, %v244_v31, 0.0  ;;  %v349_v11 = vmul.f32 %v280_v52, %v280_v52 }
  0xbc   :  { %v475_v40 = vpack.c.bf16 %v273_v35, %v272_v5  ;;  %v320_v41 = vadd.f32 %v319_v32, %v273_v35  ;;  %v342_v42 = vmul.f32 %v273_v35, %v273_v35  ;;  %v485_v43 = vpack.c.bf16 %v277_v36, %v276_v29 }
  0xbd   :  { %v224_v46 = vpop.f32.mrf.mxu2  ;;  %v234_v47 = vpop.f32.mrf.mxu3  ;;  %v346_v3 = vmul.f32 %v277_v36, %v277_v36 }
  0xbe   :  { %507 = vst [vmem:[%s754_s4 + $0x8] sm:$0xff] %v475_v40   ;;  %v321_v20 = vadd.f32 %v320_v41, %v643_v37  ;;  %v357_v48 = vadd.f32 %v356_v33, %v342_v42  ;;  %v225_v49 = vadd.f32 %v620_v19, %v224_v46  ;;  %v235_v50 = vadd.f32 %v620_v19, %v234_v47 }
  0xbf   :  { %509 = vst [vmem:[%s754_s4 + $0x18] sm:$0xff] %v485_v43  }
  0xc0   :  { %v358_v37 = vadd.f32 %v357_v48, %v343_v44  ;;  %v322_v54 = vadd.f32 %v321_v20, %v648_v45  ;;  %v248_v55 = vmax.f32 %v225_v49, 0.0  ;;  %v252_v19 = vmax.f32 %v235_v50, 0.0 }
  0xc1   :  { %v347_v45 = vmul.f32 %v667_v59, %v667_v59 }
  0xc2   :  { %v323_v57 = vadd.f32 %v322_v54, %v276_v29  ;;  %v359_v58 = vadd.f32 %v358_v37, %v344_v51  ;;  %v281_v60 = vsel %vm265_vm14, %v248_v55, 0.0  ;;  %v285_v61 = vsel %vm269_vm15, %v252_v19, 0.0 }
  0xc3   :  { %v495_v62 = vpack.c.bf16 %v281_v60, %v280_v52  ;;  %v505_v63 = vpack.c.bf16 %v285_v61, %v284_v53  ;;  %v350_v15 = vmul.f32 %v281_v60, %v281_v60  ;;  %v354_v28 = vmul.f32 %v285_v61, %v285_v61 }
  0xc4   :  { %v324_v0 = vadd.f32 %v323_v57, %v277_v36  ;;  %v360_v5 = vadd.f32 %v359_v58, %v345_v56 }
  0xc5   :  { %511 = vst [vmem:[%s754_s4 + $0x28] sm:$0xff] %v495_v62  }
  0xc6   :  { %v325_v6 = vadd.f32 %v324_v0, %v667_v59  ;;  %v361_v7 = vadd.f32 %v360_v5, %v346_v3  ;;  %513 = vst [vmem:[%s754_s4 + $0x38] sm:$0xff] %v505_v63   ;;  %v351_v59 = vmul.f32 %v672_v1, %v672_v1 }
  0xc8   :  { %v362_v8 = vadd.f32 %v361_v7, %v347_v45  ;;  %v326_v9 = vadd.f32 %v325_v6, %v674_v2  ;;  %v353_v2 = vmul.f32 %v284_v53, %v284_v53 }
  0xca   :  { %v327_v10 = vadd.f32 %v326_v9, %v280_v52  ;;  %v363_v12 = vadd.f32 %v362_v8, %v348_v24 }
  0xcc   :  { %v364_v13 = vadd.f32 %v363_v12, %v349_v11  ;;  %v328_v14 = vadd.f32 %v327_v10, %v281_v60 }
  0xce   :  { %v329_v16 = vadd.f32 %v328_v14, %v672_v1  ;;  %v365_v17 = vadd.f32 %v364_v13, %v350_v15 }
  0xd0   :  { %v366_v21 = vadd.f32 %v365_v17, %v351_v59  ;;  %v330_v22 = vadd.f32 %v329_v16, %v677_v4 }
  0xd2   :  { %v331_v23 = vadd.f32 %v330_v22, %v284_v53  ;;  %v367_v25 = vadd.f32 %v366_v21, %v352_v18 }
  0xd4   :  { %v368_v26 = vadd.f32 %v367_v25, %v353_v2  ;;  %v332_v27 = vadd.f32 %v331_v23, %v285_v61 }
  0xd6   :  { %v333_v29 = vrot.slane %v332_v27, 4  ;;  %v369_v30 = vadd.f32 %v368_v26, %v354_v28 }
  0xd8   :  { %v334_v31 = vadd.f32 %v333_v29, %v332_v27  ;;  %v370_v32 = vrot.slane %v369_v30, 4 }
  0xda   :  { %v335_v33 = vrot.slane %v334_v31, 2  ;;  %v371_v34 = vadd.f32 %v370_v32, %v369_v30 }
  0xdc   :  { %v336_v1 = vadd.f32 %v335_v33, %v334_v31  ;;  %v372_v35 = vrot.slane %v371_v34, 2 }
  0xde   :  { %v337_v36 = vrot.slane %v336_v1, 1  ;;  %v373_v38 = vadd.f32 %v372_v35, %v371_v34 }
  0xe0   :  { %v374_v39 = vrot.slane %v373_v38, 1  ;;  %v338_v40 = vadd.f32 %v337_v36, %v336_v1 }
  0xe2   :  { %v375_v4 = vadd.f32 %v374_v39, %v373_v38 }
  0xe4   :  { %v377_v41 = vsel %vm376_vm0, %v338_v40, %v375_v4 }
  0xe5   :  { %378 = vst [vmem:[%s755_s5] sm:$0x3] %v377_v41 }

</bundles_post_ra>
